<compile_context>
chip_gen: v5e
topology: v5e:2x2
jax: 0.10.0
libtpu: 0.0.40
codegen_flags: <defaults>
</compile_context>

<pallas_src>
import math

import jax
import jax.numpy as jnp
from jax.experimental import pallas as pl
from jax.experimental.pallas import tpu as pltpu

# --- tiny synthetic BERT config (config.hidden_size etc.) ---
VOCAB = 100
TYPE_VOCAB = 2
MAX_POS = 16
H = 32              # config.hidden_size (real)
N_HEADS = 2
HEAD_DIM = H // N_HEADS
INTER = 64          # intermediate_size (real)
N_LAYERS = 2
SEQ = 8
BATCH = 2
LN_EPS = 1e-12
N_CLS = 3           # nn.Linear(hidden, 3)
N_REG = 5           # nn.Linear(hidden, 5)

# lane-dense padded dims (everything 128-lane aligned)
HP = 128            # padded hidden lanes
DP = 128            # padded per-head lanes
IP = 128            # padded intermediate lanes
HEAD_PAD = 128      # padded cls|reg head output lanes
QKV_COLS = 3 * N_HEADS * DP

GELU_C = math.sqrt(2.0 / math.pi)


# ----------------------------- Pallas kernel -----------------------------

def _masked_layernorm(x, g, b, valid):
    """LayerNorm over the first H (real) lanes of a 128-lane-padded slab.

    Assumes the padding lanes of `x` are exactly zero (maintained by zero-padded
    weights/biases/gammas throughout the network), so sums over all 128 lanes
    equal sums over the real H lanes.
    """
    mean = jnp.sum(x, axis=-1, keepdims=True) * (1.0 / H)
    d = (x - mean) * valid                       # zero out padding lanes
    var = jnp.sum(d * d, axis=-1, keepdims=True) * (1.0 / H)
    return d * jax.lax.rsqrt(var + LN_EPS) * g + b   # g, b padded with zeros


def _encoder_kernel(h0_ref, mask_ref, embg_ref, embb_ref,
                    wqkv_ref, bqkv_ref, wo_ref, bo_ref,
                    ln1g_ref, ln1b_ref, wi_ref, bi_ref,
                    wf_ref, bf_ref, ln2g_ref, ln2b_ref,
                    pw_ref, pb_ref, hw_ref, hb_ref,
                    h_ref, head_ref):
    """One (sequence, layer) step; fuses embedding-LN (layer 0), the encoder
    layer, and the pooler + cls/reg heads (last layer) for one sequence."""
    lyr = pl.program_id(1)

    lane = jax.lax.broadcasted_iota(jnp.int32, (1, HP), 1)
    valid = (lane < H).astype(jnp.float32)       # (1, HP) real-lane mask

    # Embedding LayerNorm (no residual) fused into the first layer step.
    @pl.when(lyr == 0)
    def _():
        h_ref[...] = _masked_layernorm(h0_ref[...], embg_ref[...], embb_ref[...], valid)

    h = h_ref[...]                               # (SEQ, HP) f32, VMEM-resident
    mask = mask_ref[...]                         # (1, SEQ) additive key mask

    # Fused QKV projection: one (SEQ, QKV_COLS) bf16 matmul, f32 accumulate.
    qkv = jnp.dot(h.astype(jnp.bfloat16), wqkv_ref[...],
                  preferred_element_type=jnp.float32) + bqkv_ref[...]

    scale = 1.0 / math.sqrt(HEAD_DIM)
    wo = wo_ref[...]                             # (N_HEADS*DP, HP) bf16
    attn = jnp.zeros((SEQ, HP), jnp.float32)
    # N_HEADS = 2 static unroll; all slices are 128-lane / 128-row aligned.
    # (At real head counts this would become a fori_loop / batched dot_general.)
    for hh in range(N_HEADS):
        q = qkv[:, hh * DP:(hh + 1) * DP]                              # (SEQ, DP)
        k = qkv[:, (N_HEADS + hh) * DP:(N_HEADS + hh + 1) * DP]
        v = qkv[:, (2 * N_HEADS + hh) * DP:(2 * N_HEADS + hh + 1) * DP]
        # scores = q @ k^T (padding lanes are zero so they contribute nothing)
        s = jax.lax.dot_general(q.astype(jnp.bfloat16), k.astype(jnp.bfloat16),
                                (((1,), (1,)), ((), ())),
                                preferred_element_type=jnp.float32)    # (SEQ, SEQ)
        s = s * scale + mask
        s = s - jnp.max(s, axis=-1, keepdims=True)
        p = jnp.exp(s)
        p = p * pl.reciprocal(jnp.sum(p, axis=-1, keepdims=True), approx=True)
        ctx = jnp.dot(p.astype(jnp.bfloat16), v.astype(jnp.bfloat16),
                      preferred_element_type=jnp.float32)              # (SEQ, DP)
        # Head-merge folded into this head's 128-row block of Wo; accumulate.
        attn = attn + jnp.dot(ctx.astype(jnp.bfloat16), wo[hh * DP:(hh + 1) * DP, :],
                              preferred_element_type=jnp.float32)      # (SEQ, HP)
    attn = attn + bo_ref[...]

    # Post-attention residual + LayerNorm.
    h = _masked_layernorm(attn + h, ln1g_ref[...], ln1b_ref[...], valid)

    # FFN with tanh-approximate GELU (EUP) ; padding lanes stay zero (gelu(0)=0).
    inter = jnp.dot(h.astype(jnp.bfloat16), wi_ref[...],
                    preferred_element_type=jnp.float32) + bi_ref[...]
    inter = 0.5 * inter * (1.0 + jnp.tanh(
        GELU_C * (inter + 0.044715 * inter * inter * inter)))
    ffn = jnp.dot(inter.astype(jnp.bfloat16), wf_ref[...],
                  preferred_element_type=jnp.float32) + bf_ref[...]

    # Post-FFN residual + LayerNorm; write back the resident hidden slab.
    h_new = _masked_layernorm(ffn + h, ln2g_ref[...], ln2b_ref[...], valid)
    h_ref[...] = h_new

    # Pooler (dense + tanh) + concatenated cls|reg heads, fused into the last
    # layer step; output is a lane-dense (1, 128) slab per sequence.
    @pl.when(lyr == N_LAYERS - 1)
    def _():
        ft = h_new[0:1, :]                                  # [CLS] token row
        pooled = jnp.tanh(
            jnp.dot(ft.astype(jnp.bfloat16), pw_ref[...],
                    preferred_element_type=jnp.float32) + pb_ref[...])
        head_ref[...] = (jnp.dot(pooled.astype(jnp.bfloat16), hw_ref[...],
                                 preferred_element_type=jnp.float32)
                         + hb_ref[...]).astype(head_ref.dtype)


# ----------------------------- parameters -----------------------------

def _padded(real, rows, cols):
    out = jnp.zeros((rows, cols), jnp.float32)
    return out.at[:real.shape[0], :real.shape[1]].set(real)


def init_params(key):
    keys = iter(jax.random.split(key, 6 + 6 * N_LAYERS))

    def w(shape):
        return 0.02 * jax.random.normal(next(keys), shape, dtype=jnp.float32)

    p = {
        # embedding tables zero-padded to 128 lanes (pad lanes stay zero)
        "word_emb": _padded(w((VOCAB, H)), VOCAB, HP),
        "pos_emb": _padded(w((MAX_POS, H)), MAX_POS, HP),
        "type_emb": _padded(w((TYPE_VOCAB, H)), TYPE_VOCAB, HP),
        "emb_ln_g": _padded(jnp.ones((1, H), jnp.float32), 1, HP),
        "emb_ln_b": jnp.zeros((1, HP), jnp.float32),
    }

    wqkv_l, wo_l, wi_l, wf_l = [], [], [], []
    for _ in range(N_LAYERS):
        wq, wk, wv = w((H, H)), w((H, H)), w((H, H))
        # Each head's Q/K/V lands at a 128-lane-aligned column block.
        wqkv = jnp.zeros((HP, QKV_COLS), jnp.float32)
        for sec, wmat in enumerate((wq, wk, wv)):
            for hh in range(N_HEADS):
                col = (sec * N_HEADS + hh) * DP
                wqkv = wqkv.at[:H, col:col + HEAD_DIM].set(
                    wmat[:, hh * HEAD_DIM:(hh + 1) * HEAD_DIM])
        wqkv_l.append(wqkv)

        wo_r = w((H, H))
        wo = jnp.zeros((N_HEADS * DP, HP), jnp.float32)
        for hh in range(N_HEADS):
            wo = wo.at[hh * DP:hh * DP + HEAD_DIM, :H].set(
                wo_r[hh * HEAD_DIM:(hh + 1) * HEAD_DIM, :])
        wo_l.append(wo)

        wi_l.append(_padded(w((H, INTER)), HP, IP))
        wf_l.append(_padded(w((INTER, H)), IP, HP))

    # matmul weights stored bf16 (f32 accumulation in-kernel)
    p["wqkv"] = jnp.stack(wqkv_l).astype(jnp.bfloat16)
    p["wo"] = jnp.stack(wo_l).astype(jnp.bfloat16)
    p["wi"] = jnp.stack(wi_l).astype(jnp.bfloat16)
    p["wf"] = jnp.stack(wf_l).astype(jnp.bfloat16)

    # biases / LN params stay f32; padding entries are zero
    p["bqkv"] = jnp.zeros((N_LAYERS, 1, QKV_COLS), jnp.float32)
    p["bo"] = jnp.zeros((N_LAYERS, 1, HP), jnp.float32)
    p["bi"] = jnp.zeros((N_LAYERS, 1, IP), jnp.float32)
    p["bf"] = jnp.zeros((N_LAYERS, 1, HP), jnp.float32)
    ln_g = jnp.tile(_padded(jnp.ones((1, H), jnp.float32), 1, HP)[None], (N_LAYERS, 1, 1))
    p["ln1_g"] = ln_g
    p["ln2_g"] = ln_g
    p["ln1_b"] = jnp.zeros((N_LAYERS, 1, HP), jnp.float32)
    p["ln2_b"] = jnp.zeros((N_LAYERS, 1, HP), jnp.float32)

    p["pool_w"] = _padded(w((H, H)), HP, HP).astype(jnp.bfloat16)
    p["pool_b"] = jnp.zeros((1, HP), jnp.float32)

    # classifier (H,3) | regressor (H,5) concatenated, zero-padded to 128 lanes
    cls_w, reg_w = w((H, N_CLS)), w((H, N_REG))
    head_w = jnp.zeros((HP, HEAD_PAD), jnp.float32)
    head_w = head_w.at[:H, :N_CLS].set(cls_w)
    head_w = head_w.at[:H, N_CLS:N_CLS + N_REG].set(reg_w)
    p["head_w"] = head_w.astype(jnp.bfloat16)
    p["head_b"] = jnp.zeros((1, HEAD_PAD), jnp.float32)
    return p


# ----------------------------- forward pass -----------------------------

def multi_task_bert_forward(p, input_ids, attention_mask, token_type_ids):
    B, S = input_ids.shape
    M = B * S

    # embeddings (gather = plain-JAX glue); LayerNorm fused into the kernel
    pos_ids = jnp.arange(S)
    emb = (p["word_emb"][input_ids]
           + p["pos_emb"][pos_ids][None, :, :]
           + p["type_emb"][token_type_ids])
    x = emb.reshape(M, HP).astype(jnp.float32)

    # additive attention mask, shaped (B, 1, S) so its block equals full trailing dims
    ext_mask = ((1.0 - attention_mask.astype(jnp.float32)) * -10000.0).reshape(B, 1, S)

    # per-layer stacked weights: leading layer axis selected by the layer grid idx
    lspec = lambda *shape: pl.BlockSpec((None,) + shape, lambda b, l: (l, 0, 0))
    # layer/batch-invariant (shared) 2-D params
    gspec = lambda *shape: pl.BlockSpec(shape, lambda b, l: (0, 0))

    in_specs = [
        pl.BlockSpec((SEQ, HP), lambda b, l: (b, 0)),          # h0 (one sequence)
        pl.BlockSpec((None, 1, SEQ), lambda b, l: (b, 0, 0)),  # additive mask
        gspec(1, HP),                  # emb_ln_g
        gspec(1, HP),                  # emb_ln_b
        lspec(HP, QKV_COLS),           # wqkv
        lspec(1, QKV_COLS),            # bqkv
        lspec(N_HEADS * DP, HP),       # wo
        lspec(1, HP),                  # bo
        lspec(1, HP),                  # ln1_g
        lspec(1, HP),                  # ln1_b
        lspec(HP, IP),                 # wi
        lspec(1, IP),                  # bi
        lspec(IP, HP),                 # wf
        lspec(1, HP),                  # bf
        lspec(1, HP),                  # ln2_g
        lspec(1, HP),                  # ln2_b
        gspec(HP, HP),                 # pool_w
        gspec(1, HP),                  # pool_b
        gspec(HP, HEAD_PAD),           # head_w
        gspec(1, HEAD_PAD),            # head_b
    ]
    out_specs = (
        # hidden slab: constant across the layer axis => VMEM-resident per sequence
        pl.BlockSpec((SEQ, HP), lambda b, l: (b, 0)),
        # fused pooler+heads output, lane-dense (1, 128) per sequence
        pl.BlockSpec((None, 1, HEAD_PAD), lambda b, l: (b, 0, 0)),
    )
    out_shape = (
        jax.ShapeDtypeStruct((M, HP), jnp.float32),
        jax.ShapeDtypeStruct((B, 1, HEAD_PAD), jnp.float32),
    )

    _, head_out = pl.pallas_call(
        _encoder_kernel,
        grid=(B, N_LAYERS),
        in_specs=in_specs,
        out_specs=out_specs,
        out_shape=out_shape,
        # post-embedding slab aliases the hidden-state output buffer (no extra HBM)
        input_output_aliases={0: 0},
        compiler_params=pltpu.CompilerParams(
            dimension_semantics=("parallel", "arbitrary"),
            vmem_limit_bytes=64 << 20),
    )(x, ext_mask, p["emb_ln_g"], p["emb_ln_b"],
      p["wqkv"], p["bqkv"], p["wo"], p["bo"],
      p["ln1_g"], p["ln1_b"], p["wi"], p["bi"],
      p["wf"], p["bf"], p["ln2_g"], p["ln2_b"],
      p["pool_w"], p["pool_b"], p["head_w"], p["head_b"])

    head_out = head_out.reshape(B, HEAD_PAD)
    sentiment_logits = head_out[:, :N_CLS]                      # (B, 3)
    regression_out = head_out[:, N_CLS:N_CLS + N_REG]           # (B, 5)
    return sentiment_logits, regression_out


# ----------------------------- main -----------------------------

if __name__ == "__main__":
    key = jax.random.PRNGKey(0)
    k_param, k_ids = jax.random.split(key)

    params = init_params(k_param)

    input_ids = jax.random.randint(k_ids, (BATCH, SEQ), 0, VOCAB, dtype=jnp.int32)
    attention_mask = jnp.ones((BATCH, SEQ), dtype=jnp.int32)
    attention_mask = attention_mask.at[1, SEQ - 2:].set(0)      # a little padding
    token_type_ids = jnp.zeros((BATCH, SEQ), dtype=jnp.int32)

    fwd = jax.jit(multi_task_bert_forward)
    sent_logits, reg_out = fwd(params, input_ids, attention_mask, token_type_ids)
    jax.block_until_ready((sent_logits, reg_out))

    assert sent_logits.shape == (BATCH, N_CLS)
    assert reg_out.shape == (BATCH, N_REG)
    assert bool(jnp.all(jnp.isfinite(sent_logits))) and bool(jnp.all(jnp.isfinite(reg_out)))
    print("KERNEL_OK")
</pallas_src>

<mosaic_0001>
module attributes {stable_mosaic.version = 11 : i64} {
  func.func @_encoder_kernel(%arg0: i32, %arg1: i32, %arg2: memref<8x128xf32, #tpu.memory_space<vmem>>, %arg3: memref<1x1x8xf32, #tpu.memory_space<vmem>>, %arg4: memref<1x128xf32, #tpu.memory_space<vmem>>, %arg5: memref<1x128xf32, #tpu.memory_space<vmem>>, %arg6: memref<1x128x768xbf16, #tpu.memory_space<vmem>>, %arg7: memref<1x1x768xf32, #tpu.memory_space<vmem>>, %arg8: memref<1x256x128xbf16, #tpu.memory_space<vmem>>, %arg9: memref<1x1x128xf32, #tpu.memory_space<vmem>>, %arg10: memref<1x1x128xf32, #tpu.memory_space<vmem>>, %arg11: memref<1x1x128xf32, #tpu.memory_space<vmem>>, %arg12: memref<1x128x128xbf16, #tpu.memory_space<vmem>>, %arg13: memref<1x1x128xf32, #tpu.memory_space<vmem>>, %arg14: memref<1x128x128xbf16, #tpu.memory_space<vmem>>, %arg15: memref<1x1x128xf32, #tpu.memory_space<vmem>>, %arg16: memref<1x1x128xf32, #tpu.memory_space<vmem>>, %arg17: memref<1x1x128xf32, #tpu.memory_space<vmem>>, %arg18: memref<128x128xbf16, #tpu.memory_space<vmem>>, %arg19: memref<1x128xf32, #tpu.memory_space<vmem>>, %arg20: memref<128x128xbf16, #tpu.memory_space<vmem>>, %arg21: memref<1x128xf32, #tpu.memory_space<vmem>>, %arg22: memref<8x128xf32, #tpu.memory_space<vmem>>, %arg23: memref<1x1x128xf32, #tpu.memory_space<vmem>>) attributes {dimension_semantics = [#tpu.dimension_semantics<parallel>, #tpu.dimension_semantics<arbitrary>], iteration_bounds = array<i64: 2, 2>, scalar_prefetch = 0 : i64, scratch_operands = 0 : i64, tpu.core_type = #tpu.core_type<tc>, window_params = [{transform_indices = @transform_0, window_bounds = array<i64: 8, 128>}, {transform_indices = @transform_1, window_bounds = array<i64: 1, 1, 8>}, {pipeline_mode = #tpu.pipeline_mode<synchronous>, transform_indices = @transform_2, window_bounds = array<i64: 1, 128>}, {pipeline_mode = #tpu.pipeline_mode<synchronous>, transform_indices = @transform_3, window_bounds = array<i64: 1, 128>}, {transform_indices = @transform_4, window_bounds = array<i64: 1, 128, 768>}, {transform_indices = @transform_5, window_bounds = array<i64: 1, 1, 768>}, {transform_indices = @transform_6, window_bounds = array<i64: 1, 256, 128>}, {transform_indices = @transform_7, window_bounds = array<i64: 1, 1, 128>}, {transform_indices = @transform_8, window_bounds = array<i64: 1, 1, 128>}, {transform_indices = @transform_9, window_bounds = array<i64: 1, 1, 128>}, {transform_indices = @transform_10, window_bounds = array<i64: 1, 128, 128>}, {transform_indices = @transform_11, window_bounds = array<i64: 1, 1, 128>}, {transform_indices = @transform_12, window_bounds = array<i64: 1, 128, 128>}, {transform_indices = @transform_13, window_bounds = array<i64: 1, 1, 128>}, {transform_indices = @transform_14, window_bounds = array<i64: 1, 1, 128>}, {transform_indices = @transform_15, window_bounds = array<i64: 1, 1, 128>}, {pipeline_mode = #tpu.pipeline_mode<synchronous>, transform_indices = @transform_16, window_bounds = array<i64: 128, 128>}, {pipeline_mode = #tpu.pipeline_mode<synchronous>, transform_indices = @transform_17, window_bounds = array<i64: 1, 128>}, {pipeline_mode = #tpu.pipeline_mode<synchronous>, transform_indices = @transform_18, window_bounds = array<i64: 128, 128>}, {pipeline_mode = #tpu.pipeline_mode<synchronous>, transform_indices = @transform_19, window_bounds = array<i64: 1, 128>}, {transform_indices = @transform_20, window_bounds = array<i64: 8, 128>}, {transform_indices = @transform_21, window_bounds = array<i64: 1, 1, 128>}]} {
    %0 = tpu.iota {dimensions = array<i32: 1>} : vector<1x128xi32>
    %c32_i32 = arith.constant 32 : i32
    %1 = vector.broadcast %c32_i32 : i32 to vector<1x128xi32>
    %2 = arith.cmpi slt, %0, %1 : vector<1x128xi32>
    %3 = arith.extui %2 : vector<1x128xi1> to vector<1x128xi32>
    %4 = arith.sitofp %3 : vector<1x128xi32> to vector<1x128xf32>
    %c0_i32 = arith.constant 0 : i32
    %5 = arith.cmpi eq, %arg1, %c0_i32 : i32
    %6 = arith.extui %5 : i1 to i32
    %c0_i32_0 = arith.constant 0 : i32
    %7 = arith.cmpi ne, %6, %c0_i32_0 : i32
    scf.if %7 {
      %c0_73 = arith.constant 0 : index
      %c0_74 = arith.constant 0 : index
      %167 = vector.load %arg2[%c0_73, %c0_74] : memref<8x128xf32, #tpu.memory_space<vmem>>, vector<8x128xf32>
      %c0_75 = arith.constant 0 : index
      %c0_76 = arith.constant 0 : index
      %168 = vector.load %arg4[%c0_75, %c0_76] : memref<1x128xf32, #tpu.memory_space<vmem>>, vector<1x128xf32>
      %c0_77 = arith.constant 0 : index
      %c0_78 = arith.constant 0 : index
      %169 = vector.load %arg5[%c0_77, %c0_78] : memref<1x128xf32, #tpu.memory_space<vmem>>, vector<1x128xf32>
      %cst_79 = arith.constant dense<0.000000e+00> : vector<8xf32>
      %170 = vector.multi_reduction <add>, %167, %cst_79 [1] : vector<8x128xf32> to vector<8xf32>
      %171 = vector.shape_cast %170 : vector<8xf32> to vector<8x1xf32>
      %cst_80 = arith.constant 3.125000e-02 : f32
      %172 = vector.broadcast %cst_80 : f32 to vector<8x1xf32>
      %173 = arith.mulf %171, %172 : vector<8x1xf32>
      %174 = vector.broadcast %173 : vector<8x1xf32> to vector<8x128xf32>
      %175 = arith.subf %167, %174 : vector<8x128xf32>
      %176 = vector.broadcast %4 : vector<1x128xf32> to vector<8x128xf32>
      %177 = arith.mulf %175, %176 : vector<8x128xf32>
      %178 = arith.mulf %177, %177 : vector<8x128xf32>
      %cst_81 = arith.constant dense<0.000000e+00> : vector<8xf32>
      %179 = vector.multi_reduction <add>, %178, %cst_81 [1] : vector<8x128xf32> to vector<8xf32>
      %180 = vector.shape_cast %179 : vector<8xf32> to vector<8x1xf32>
      %cst_82 = arith.constant 3.125000e-02 : f32
      %181 = vector.broadcast %cst_82 : f32 to vector<8x1xf32>
      %182 = arith.mulf %180, %181 : vector<8x1xf32>
      %cst_83 = arith.constant 9.99999996E-13 : f32
      %183 = vector.broadcast %cst_83 : f32 to vector<8x1xf32>
      %184 = arith.addf %182, %183 : vector<8x1xf32>
      %185 = math.rsqrt %184 : vector<8x1xf32>
      %186 = vector.broadcast %185 : vector<8x1xf32> to vector<8x128xf32>
      %187 = arith.mulf %177, %186 : vector<8x128xf32>
      %188 = vector.broadcast %168 : vector<1x128xf32> to vector<8x128xf32>
      %189 = arith.mulf %187, %188 : vector<8x128xf32>
      %190 = vector.broadcast %169 : vector<1x128xf32> to vector<8x128xf32>
      %191 = arith.addf %189, %190 : vector<8x128xf32>
      %c0_84 = arith.constant 0 : index
      %c0_85 = arith.constant 0 : index
      %192 = vector.load %arg22[%c0_84, %c0_85] : memref<8x128xf32, #tpu.memory_space<vmem>>, vector<8x128xf32>
      tpu.vector_store %arg22[%c0_84, %c0_85], %191 {strides = array<i32>} : memref<8x128xf32, #tpu.memory_space<vmem>>, vector<8x128xf32>,
    } else {
    }
    %c0 = arith.constant 0 : index
    %c0_1 = arith.constant 0 : index
    %8 = vector.load %arg22[%c0, %c0_1] : memref<8x128xf32, #tpu.memory_space<vmem>>, vector<8x128xf32>
    %c0_2 = arith.constant 0 : index
    %c0_3 = arith.constant 0 : index
    %c0_4 = arith.constant 0 : index
    %9 = vector.load %arg3[%c0_2, %c0_3, %c0_4] : memref<1x1x8xf32, #tpu.memory_space<vmem>>, vector<1x1x8xf32>
    %10 = vector.shape_cast %9 : vector<1x1x8xf32> to vector<1x8xf32>
    %11 = arith.truncf %8 : vector<8x128xf32> to vector<8x128xbf16>
    %c0_5 = arith.constant 0 : index
    %c0_6 = arith.constant 0 : index
    %c0_7 = arith.constant 0 : index
    %12 = vector.load %arg6[%c0_5, %c0_6, %c0_7] : memref<1x128x768xbf16, #tpu.memory_space<vmem>>, vector<1x128x768xbf16>
    %13 = vector.shape_cast %12 : vector<1x128x768xbf16> to vector<128x768xbf16>
    %cst = arith.constant dense<0.000000e+00> : vector<8x768xf32>
    %14 = tpu.matmul %11, %13, %cst {dimension_numbers = #tpu.dot_dimension_numbers<[1], [0], [0], [1], [0, 0, 1, 1], [], []>} : vector<8x128xbf16>, vector<128x768xbf16>, vector<8x768xf32> -> vector<8x768xf32>
    %c0_8 = arith.constant 0 : index
    %c0_9 = arith.constant 0 : index
    %c0_10 = arith.constant 0 : index
    %15 = vector.load %arg7[%c0_8, %c0_9, %c0_10] : memref<1x1x768xf32, #tpu.memory_space<vmem>>, vector<1x1x768xf32>
    %16 = vector.shape_cast %15 : vector<1x1x768xf32> to vector<1x768xf32>
    %17 = vector.broadcast %16 : vector<1x768xf32> to vector<8x768xf32>
    %18 = arith.addf %14, %17 : vector<8x768xf32>
    %c0_11 = arith.constant 0 : index
    %c0_12 = arith.constant 0 : index
    %c0_13 = arith.constant 0 : index
    %19 = vector.load %arg8[%c0_11, %c0_12, %c0_13] : memref<1x256x128xbf16, #tpu.memory_space<vmem>>, vector<1x256x128xbf16>
    %20 = vector.shape_cast %19 : vector<1x256x128xbf16> to vector<256x128xbf16>
    %cst_14 = arith.constant 0.000000e+00 : f32
    %21 = vector.broadcast %cst_14 : f32 to vector<8x128xf32>
    %22 = vector.extract_strided_slice %18 {offsets = [0, 0], sizes = [8, 128], strides = [1, 1]} : vector<8x768xf32> to vector<8x128xf32>
    %23 = vector.extract_strided_slice %18 {offsets = [0, 256], sizes = [8, 128], strides = [1, 1]} : vector<8x768xf32> to vector<8x128xf32>
    %24 = vector.extract_strided_slice %18 {offsets = [0, 512], sizes = [8, 128], strides = [1, 1]} : vector<8x768xf32> to vector<8x128xf32>
    %25 = arith.truncf %22 : vector<8x128xf32> to vector<8x128xbf16>
    %26 = arith.truncf %23 : vector<8x128xf32> to vector<8x128xbf16>
    %cst_15 = arith.constant dense<0.000000e+00> : vector<8x8xf32>
    %27 = tpu.matmul %25, %26, %cst_15 {dimension_numbers = #tpu.dot_dimension_numbers<[1], [1], [0], [0], [0, 0, 1, 0], [], []>} : vector<8x128xbf16>, vector<8x128xbf16>, vector<8x8xf32> -> vector<8x8xf32>
    %cst_16 = arith.constant 2.500000e-01 : f32
    %28 = vector.broadcast %cst_16 : f32 to vector<8x8xf32>
    %29 = arith.mulf %27, %28 : vector<8x8xf32>
    %30 = vector.broadcast %10 : vector<1x8xf32> to vector<8x8xf32>
    %31 = arith.addf %29, %30 : vector<8x8xf32>
    %cst_17 = arith.constant dense<0xFF800000> : vector<8xf32>
    %32 = vector.multi_reduction <maximumf>, %31, %cst_17 [1] : vector<8x8xf32> to vector<8xf32>
    %33 = vector.shape_cast %32 : vector<8xf32> to vector<8x1xf32>
    %34 = vector.broadcast %33 : vector<8x1xf32> to vector<8x8xf32>
    %35 = arith.subf %31, %34 : vector<8x8xf32>
    %36 = math.exp %35 : vector<8x8xf32>
    %cst_18 = arith.constant dense<0.000000e+00> : vector<8xf32>
    %37 = vector.multi_reduction <add>, %36, %cst_18 [1] : vector<8x8xf32> to vector<8xf32>
    %38 = vector.shape_cast %37 : vector<8xf32> to vector<8x1xf32>
    %39 = tpu.reciprocal %38 {approx = true} : vector<8x1xf32> -> vector<8x1xf32>
    %40 = vector.broadcast %39 : vector<8x1xf32> to vector<8x8xf32>
    %41 = arith.mulf %36, %40 : vector<8x8xf32>
    %42 = arith.truncf %41 : vector<8x8xf32> to vector<8x8xbf16>
    %43 = arith.truncf %24 : vector<8x128xf32> to vector<8x128xbf16>
    %cst_19 = arith.constant dense<0.000000e+00> : vector<8x128xf32>
    %44 = tpu.matmul %42, %43, %cst_19 {dimension_numbers = #tpu.dot_dimension_numbers<[1], [0], [0], [1], [0, 0, 1, 1], [], []>} : vector<8x8xbf16>, vector<8x128xbf16>, vector<8x128xf32> -> vector<8x128xf32>
    %45 = arith.truncf %44 : vector<8x128xf32> to vector<8x128xbf16>
    %46 = vector.extract_strided_slice %20 {offsets = [0, 0], sizes = [128, 128], strides = [1, 1]} : vector<256x128xbf16> to vector<128x128xbf16>
    %cst_20 = arith.constant dense<0.000000e+00> : vector<8x128xf32>
    %47 = tpu.matmul %45, %46, %cst_20 {dimension_numbers = #tpu.dot_dimension_numbers<[1], [0], [0], [1], [0, 0, 1, 1], [], []>} : vector<8x128xbf16>, vector<128x128xbf16>, vector<8x128xf32> -> vector<8x128xf32>
    %48 = arith.addf %21, %47 : vector<8x128xf32>
    %49 = vector.extract_strided_slice %18 {offsets = [0, 128], sizes = [8, 128], strides = [1, 1]} : vector<8x768xf32> to vector<8x128xf32>
    %50 = vector.extract_strided_slice %18 {offsets = [0, 384], sizes = [8, 128], strides = [1, 1]} : vector<8x768xf32> to vector<8x128xf32>
    %51 = vector.extract_strided_slice %18 {offsets = [0, 640], sizes = [8, 128], strides = [1, 1]} : vector<8x768xf32> to vector<8x128xf32>
    %52 = arith.truncf %49 : vector<8x128xf32> to vector<8x128xbf16>
    %53 = arith.truncf %50 : vector<8x128xf32> to vector<8x128xbf16>
    %cst_21 = arith.constant dense<0.000000e+00> : vector<8x8xf32>
    %54 = tpu.matmul %52, %53, %cst_21 {dimension_numbers = #tpu.dot_dimension_numbers<[1], [1], [0], [0], [0, 0, 1, 0], [], []>} : vector<8x128xbf16>, vector<8x128xbf16>, vector<8x8xf32> -> vector<8x8xf32>
    %cst_22 = arith.constant 2.500000e-01 : f32
    %55 = vector.broadcast %cst_22 : f32 to vector<8x8xf32>
    %56 = arith.mulf %54, %55 : vector<8x8xf32>
    %57 = vector.broadcast %10 : vector<1x8xf32> to vector<8x8xf32>
    %58 = arith.addf %56, %57 : vector<8x8xf32>
    %cst_23 = arith.constant dense<0xFF800000> : vector<8xf32>
    %59 = vector.multi_reduction <maximumf>, %58, %cst_23 [1] : vector<8x8xf32> to vector<8xf32>
    %60 = vector.shape_cast %59 : vector<8xf32> to vector<8x1xf32>
    %61 = vector.broadcast %60 : vector<8x1xf32> to vector<8x8xf32>
    %62 = arith.subf %58, %61 : vector<8x8xf32>
    %63 = math.exp %62 : vector<8x8xf32>
    %cst_24 = arith.constant dense<0.000000e+00> : vector<8xf32>
    %64 = vector.multi_reduction <add>, %63, %cst_24 [1] : vector<8x8xf32> to vector<8xf32>
    %65 = vector.shape_cast %64 : vector<8xf32> to vector<8x1xf32>
    %66 = tpu.reciprocal %65 {approx = true} : vector<8x1xf32> -> vector<8x1xf32>
    %67 = vector.broadcast %66 : vector<8x1xf32> to vector<8x8xf32>
    %68 = arith.mulf %63, %67 : vector<8x8xf32>
    %69 = arith.truncf %68 : vector<8x8xf32> to vector<8x8xbf16>
    %70 = arith.truncf %51 : vector<8x128xf32> to vector<8x128xbf16>
    %cst_25 = arith.constant dense<0.000000e+00> : vector<8x128xf32>
    %71 = tpu.matmul %69, %70, %cst_25 {dimension_numbers = #tpu.dot_dimension_numbers<[1], [0], [0], [1], [0, 0, 1, 1], [], []>} : vector<8x8xbf16>, vector<8x128xbf16>, vector<8x128xf32> -> vector<8x128xf32>
    %72 = arith.truncf %71 : vector<8x128xf32> to vector<8x128xbf16>
    %73 = vector.extract_strided_slice %20 {offsets = [128, 0], sizes = [128, 128], strides = [1, 1]} : vector<256x128xbf16> to vector<128x128xbf16>
    %cst_26 = arith.constant dense<0.000000e+00> : vector<8x128xf32>
    %74 = tpu.matmul %72, %73, %cst_26 {dimension_numbers = #tpu.dot_dimension_numbers<[1], [0], [0], [1], [0, 0, 1, 1], [], []>} : vector<8x128xbf16>, vector<128x128xbf16>, vector<8x128xf32> -> vector<8x128xf32>
    %75 = arith.addf %48, %74 : vector<8x128xf32>
    %c0_27 = arith.constant 0 : index
    %c0_28 = arith.constant 0 : index
    %c0_29 = arith.constant 0 : index
    %76 = vector.load %arg9[%c0_27, %c0_28, %c0_29] : memref<1x1x128xf32, #tpu.memory_space<vmem>>, vector<1x1x128xf32>
    %77 = vector.shape_cast %76 : vector<1x1x128xf32> to vector<1x128xf32>
    %78 = vector.broadcast %77 : vector<1x128xf32> to vector<8x128xf32>
    %79 = arith.addf %75, %78 : vector<8x128xf32>
    %80 = arith.addf %79, %8 : vector<8x128xf32>
    %c0_30 = arith.constant 0 : index
    %c0_31 = arith.constant 0 : index
    %c0_32 = arith.constant 0 : index
    %81 = vector.load %arg10[%c0_30, %c0_31, %c0_32] : memref<1x1x128xf32, #tpu.memory_space<vmem>>, vector<1x1x128xf32>
    %82 = vector.shape_cast %81 : vector<1x1x128xf32> to vector<1x128xf32>
    %c0_33 = arith.constant 0 : index
    %c0_34 = arith.constant 0 : index
    %c0_35 = arith.constant 0 : index
    %83 = vector.load %arg11[%c0_33, %c0_34, %c0_35] : memref<1x1x128xf32, #tpu.memory_space<vmem>>, vector<1x1x128xf32>
    %84 = vector.shape_cast %83 : vector<1x1x128xf32> to vector<1x128xf32>
    %cst_36 = arith.constant dense<0.000000e+00> : vector<8xf32>
    %85 = vector.multi_reduction <add>, %80, %cst_36 [1] : vector<8x128xf32> to vector<8xf32>
    %86 = vector.shape_cast %85 : vector<8xf32> to vector<8x1xf32>
    %cst_37 = arith.constant 3.125000e-02 : f32
    %87 = vector.broadcast %cst_37 : f32 to vector<8x1xf32>
    %88 = arith.mulf %86, %87 : vector<8x1xf32>
    %89 = vector.broadcast %88 : vector<8x1xf32> to vector<8x128xf32>
    %90 = arith.subf %80, %89 : vector<8x128xf32>
    %91 = vector.broadcast %4 : vector<1x128xf32> to vector<8x128xf32>
    %92 = arith.mulf %90, %91 : vector<8x128xf32>
    %93 = arith.mulf %92, %92 : vector<8x128xf32>
    %cst_38 = arith.constant dense<0.000000e+00> : vector<8xf32>
    %94 = vector.multi_reduction <add>, %93, %cst_38 [1] : vector<8x128xf32> to vector<8xf32>
    %95 = vector.shape_cast %94 : vector<8xf32> to vector<8x1xf32>
    %cst_39 = arith.constant 3.125000e-02 : f32
    %96 = vector.broadcast %cst_39 : f32 to vector<8x1xf32>
    %97 = arith.mulf %95, %96 : vector<8x1xf32>
    %cst_40 = arith.constant 9.99999996E-13 : f32
    %98 = vector.broadcast %cst_40 : f32 to vector<8x1xf32>
    %99 = arith.addf %97, %98 : vector<8x1xf32>
    %100 = math.rsqrt %99 : vector<8x1xf32>
    %101 = vector.broadcast %100 : vector<8x1xf32> to vector<8x128xf32>
    %102 = arith.mulf %92, %101 : vector<8x128xf32>
    %103 = vector.broadcast %82 : vector<1x128xf32> to vector<8x128xf32>
    %104 = arith.mulf %102, %103 : vector<8x128xf32>
    %105 = vector.broadcast %84 : vector<1x128xf32> to vector<8x128xf32>
    %106 = arith.addf %104, %105 : vector<8x128xf32>
    %107 = arith.truncf %106 : vector<8x128xf32> to vector<8x128xbf16>
    %c0_41 = arith.constant 0 : index
    %c0_42 = arith.constant 0 : index
    %c0_43 = arith.constant 0 : index
    %108 = vector.load %arg12[%c0_41, %c0_42, %c0_43] : memref<1x128x128xbf16, #tpu.memory_space<vmem>>, vector<1x128x128xbf16>
    %109 = vector.shape_cast %108 : vector<1x128x128xbf16> to vector<128x128xbf16>
    %cst_44 = arith.constant dense<0.000000e+00> : vector<8x128xf32>
    %110 = tpu.matmul %107, %109, %cst_44 {dimension_numbers = #tpu.dot_dimension_numbers<[1], [0], [0], [1], [0, 0, 1, 1], [], []>} : vector<8x128xbf16>, vector<128x128xbf16>, vector<8x128xf32> -> vector<8x128xf32>
    %c0_45 = arith.constant 0 : index
    %c0_46 = arith.constant 0 : index
    %c0_47 = arith.constant 0 : index
    %111 = vector.load %arg13[%c0_45, %c0_46, %c0_47] : memref<1x1x128xf32, #tpu.memory_space<vmem>>, vector<1x1x128xf32>
    %112 = vector.shape_cast %111 : vector<1x1x128xf32> to vector<1x128xf32>
    %113 = vector.broadcast %112 : vector<1x128xf32> to vector<8x128xf32>
    %114 = arith.addf %110, %113 : vector<8x128xf32>
    %cst_48 = arith.constant 5.000000e-01 : f32
    %115 = vector.broadcast %cst_48 : f32 to vector<8x128xf32>
    %116 = arith.mulf %115, %114 : vector<8x128xf32>
    %cst_49 = arith.constant 4.471500e-02 : f32
    %117 = vector.broadcast %cst_49 : f32 to vector<8x128xf32>
    %118 = arith.mulf %117, %114 : vector<8x128xf32>
    %119 = arith.mulf %118, %114 : vector<8x128xf32>
    %120 = arith.mulf %119, %114 : vector<8x128xf32>
    %121 = arith.addf %114, %120 : vector<8x128xf32>
    %cst_50 = arith.constant 0.797884583 : f32
    %122 = vector.broadcast %cst_50 : f32 to vector<8x128xf32>
    %123 = arith.mulf %122, %121 : vector<8x128xf32>
    %124 = math.tanh %123 : vector<8x128xf32>
    %cst_51 = arith.constant 1.000000e+00 : f32
    %125 = vector.broadcast %cst_51 : f32 to vector<8x128xf32>
    %126 = arith.addf %125, %124 : vector<8x128xf32>
    %127 = arith.mulf %116, %126 : vector<8x128xf32>
    %128 = arith.truncf %127 : vector<8x128xf32> to vector<8x128xbf16>
    %c0_52 = arith.constant 0 : index
    %c0_53 = arith.constant 0 : index
    %c0_54 = arith.constant 0 : index
    %129 = vector.load %arg14[%c0_52, %c0_53, %c0_54] : memref<1x128x128xbf16, #tpu.memory_space<vmem>>, vector<1x128x128xbf16>
    %130 = vector.shape_cast %129 : vector<1x128x128xbf16> to vector<128x128xbf16>
    %cst_55 = arith.constant dense<0.000000e+00> : vector<8x128xf32>
    %131 = tpu.matmul %128, %130, %cst_55 {dimension_numbers = #tpu.dot_dimension_numbers<[1], [0], [0], [1], [0, 0, 1, 1], [], []>} : vector<8x128xbf16>, vector<128x128xbf16>, vector<8x128xf32> -> vector<8x128xf32>
    %c0_56 = arith.constant 0 : index
    %c0_57 = arith.constant 0 : index
    %c0_58 = arith.constant 0 : index
    %132 = vector.load %arg15[%c0_56, %c0_57, %c0_58] : memref<1x1x128xf32, #tpu.memory_space<vmem>>, vector<1x1x128xf32>
    %133 = vector.shape_cast %132 : vector<1x1x128xf32> to vector<1x128xf32>
    %134 = vector.broadcast %133 : vector<1x128xf32> to vector<8x128xf32>
    %135 = arith.addf %131, %134 : vector<8x128xf32>
    %136 = arith.addf %135, %106 : vector<8x128xf32>
    %c0_59 = arith.constant 0 : index
    %c0_60 = arith.constant 0 : index
    %c0_61 = arith.constant 0 : index
    %137 = vector.load %arg16[%c0_59, %c0_60, %c0_61] : memref<1x1x128xf32, #tpu.memory_space<vmem>>, vector<1x1x128xf32>
    %138 = vector.shape_cast %137 : vector<1x1x128xf32> to vector<1x128xf32>
    %c0_62 = arith.constant 0 : index
    %c0_63 = arith.constant 0 : index
    %c0_64 = arith.constant 0 : index
    %139 = vector.load %arg17[%c0_62, %c0_63, %c0_64] : memref<1x1x128xf32, #tpu.memory_space<vmem>>, vector<1x1x128xf32>
    %140 = vector.shape_cast %139 : vector<1x1x128xf32> to vector<1x128xf32>
    %cst_65 = arith.constant dense<0.000000e+00> : vector<8xf32>
    %141 = vector.multi_reduction <add>, %136, %cst_65 [1] : vector<8x128xf32> to vector<8xf32>
    %142 = vector.shape_cast %141 : vector<8xf32> to vector<8x1xf32>
    %cst_66 = arith.constant 3.125000e-02 : f32
    %143 = vector.broadcast %cst_66 : f32 to vector<8x1xf32>
    %144 = arith.mulf %142, %143 : vector<8x1xf32>
    %145 = vector.broadcast %144 : vector<8x1xf32> to vector<8x128xf32>
    %146 = arith.subf %136, %145 : vector<8x128xf32>
    %147 = vector.broadcast %4 : vector<1x128xf32> to vector<8x128xf32>
    %148 = arith.mulf %146, %147 : vector<8x128xf32>
    %149 = arith.mulf %148, %148 : vector<8x128xf32>
    %cst_67 = arith.constant dense<0.000000e+00> : vector<8xf32>
    %150 = vector.multi_reduction <add>, %149, %cst_67 [1] : vector<8x128xf32> to vector<8xf32>
    %151 = vector.shape_cast %150 : vector<8xf32> to vector<8x1xf32>
    %cst_68 = arith.constant 3.125000e-02 : f32
    %152 = vector.broadcast %cst_68 : f32 to vector<8x1xf32>
    %153 = arith.mulf %151, %152 : vector<8x1xf32>
    %cst_69 = arith.constant 9.99999996E-13 : f32
    %154 = vector.broadcast %cst_69 : f32 to vector<8x1xf32>
    %155 = arith.addf %153, %154 : vector<8x1xf32>
    %156 = math.rsqrt %155 : vector<8x1xf32>
    %157 = vector.broadcast %156 : vector<8x1xf32> to vector<8x128xf32>
    %158 = arith.mulf %148, %157 : vector<8x128xf32>
    %159 = vector.broadcast %138 : vector<1x128xf32> to vector<8x128xf32>
    %160 = arith.mulf %158, %159 : vector<8x128xf32>
    %161 = vector.broadcast %140 : vector<1x128xf32> to vector<8x128xf32>
    %162 = arith.addf %160, %161 : vector<8x128xf32>
    %c0_70 = arith.constant 0 : index
    %c0_71 = arith.constant 0 : index
    %163 = vector.load %arg22[%c0_70, %c0_71] : memref<8x128xf32, #tpu.memory_space<vmem>>, vector<8x128xf32>
    tpu.vector_store %arg22[%c0_70, %c0_71], %162 {strides = array<i32>} : memref<8x128xf32, #tpu.memory_space<vmem>>, vector<8x128xf32>,
    %c1_i32 = arith.constant 1 : i32
    %164 = arith.cmpi eq, %arg1, %c1_i32 : i32
    %165 = arith.extui %164 : i1 to i32
    %c0_i32_72 = arith.constant 0 : i32
    %166 = arith.cmpi ne, %165, %c0_i32_72 : i32
    scf.if %166 {
      %167 = vector.extract_strided_slice %162 {offsets = [0, 0], sizes = [1, 128], strides = [1, 1]} : vector<8x128xf32> to vector<1x128xf32>
      %168 = arith.truncf %167 : vector<1x128xf32> to vector<1x128xbf16>
      %c0_73 = arith.constant 0 : index
      %c0_74 = arith.constant 0 : index
      %169 = vector.load %arg18[%c0_73, %c0_74] : memref<128x128xbf16, #tpu.memory_space<vmem>>, vector<128x128xbf16>
      %cst_75 = arith.constant dense<0.000000e+00> : vector<1x128xf32>
      %170 = tpu.matmul %168, %169, %cst_75 {dimension_numbers = #tpu.dot_dimension_numbers<[1], [0], [0], [1], [0, 0, 1, 1], [], []>} : vector<1x128xbf16>, vector<128x128xbf16>, vector<1x128xf32> -> vector<1x128xf32>
      %c0_76 = arith.constant 0 : index
      %c0_77 = arith.constant 0 : index
      %171 = vector.load %arg19[%c0_76, %c0_77] : memref<1x128xf32, #tpu.memory_space<vmem>>, vector<1x128xf32>
      %172 = arith.addf %170, %171 : vector<1x128xf32>
      %173 = math.tanh %172 : vector<1x128xf32>
      %174 = arith.truncf %173 : vector<1x128xf32> to vector<1x128xbf16>
      %c0_78 = arith.constant 0 : index
      %c0_79 = arith.constant 0 : index
      %175 = vector.load %arg20[%c0_78, %c0_79] : memref<128x128xbf16, #tpu.memory_space<vmem>>, vector<128x128xbf16>
      %cst_80 = arith.constant dense<0.000000e+00> : vector<1x128xf32>
      %176 = tpu.matmul %174, %175, %cst_80 {dimension_numbers = #tpu.dot_dimension_numbers<[1], [0], [0], [1], [0, 0, 1, 1], [], []>} : vector<1x128xbf16>, vector<128x128xbf16>, vector<1x128xf32> -> vector<1x128xf32>
      %c0_81 = arith.constant 0 : index
      %c0_82 = arith.constant 0 : index
      %177 = vector.load %arg21[%c0_81, %c0_82] : memref<1x128xf32, #tpu.memory_space<vmem>>, vector<1x128xf32>
      %178 = arith.addf %176, %177 : vector<1x128xf32>
      %c0_83 = arith.constant 0 : index
      %c0_84 = arith.constant 0 : index
      %c0_85 = arith.constant 0 : index
      %179 = vector.load %arg23[%c0_83, %c0_84, %c0_85] : memref<1x1x128xf32, #tpu.memory_space<vmem>>, vector<1x1x128xf32>
      %180 = vector.shape_cast %179 : vector<1x1x128xf32> to vector<1x128xf32>
      %181 = vector.shape_cast %178 : vector<1x128xf32> to vector<1x1x128xf32>
      tpu.vector_store %arg23[%c0_83, %c0_84, %c0_85], %181 {strides = array<i32>} : memref<1x1x128xf32, #tpu.memory_space<vmem>>, vector<1x1x128xf32>,
    } else {
    }
    return
  }
  func.func @transform_0(%arg0: i32, %arg1: i32) -> (i32, i32) {
    %c0_i32 = arith.constant 0 : i32
    %c0_i32_0 = arith.constant 0 : i32
    return %arg0, %c0_i32 : i32, i32
  }
  func.func @transform_1(%arg0: i32, %arg1: i32) -> (i32, i32, i32) {
    %c0_i32 = arith.constant 0 : i32
    %c0_i32_0 = arith.constant 0 : i32
    %c0_i32_1 = arith.constant 0 : i32
    return %arg0, %c0_i32, %c0_i32_0 : i32, i32, i32
  }
  func.func @transform_2(%arg0: i32, %arg1: i32) -> (i32, i32) {
    %c0_i32 = arith.constant 0 : i32
    %c0_i32_0 = arith.constant 0 : i32
    %c0_i32_1 = arith.constant 0 : i32
    return %c0_i32, %c0_i32_0 : i32, i32
  }
  func.func @transform_3(%arg0: i32, %arg1: i32) -> (i32, i32) {
    %c0_i32 = arith.constant 0 : i32
    %c0_i32_0 = arith.constant 0 : i32
    %c0_i32_1 = arith.constant 0 : i32
    return %c0_i32, %c0_i32_0 : i32, i32
  }
  func.func @transform_4(%arg0: i32, %arg1: i32) -> (i32, i32, i32) {
    %c0_i32 = arith.constant 0 : i32
    %c0_i32_0 = arith.constant 0 : i32
    %c0_i32_1 = arith.constant 0 : i32
    return %arg1, %c0_i32, %c0_i32_0 : i32, i32, i32
  }
  func.func @transform_5(%arg0: i32, %arg1: i32) -> (i32, i32, i32) {
    %c0_i32 = arith.constant 0 : i32
    %c0_i32_0 = arith.constant 0 : i32
    %c0_i32_1 = arith.constant 0 : i32
    return %arg1, %c0_i32, %c0_i32_0 : i32, i32, i32
  }
  func.func @transform_6(%arg0: i32, %arg1: i32) -> (i32, i32, i32) {
    %c0_i32 = arith.constant 0 : i32
    %c0_i32_0 = arith.constant 0 : i32
    %c0_i32_1 = arith.constant 0 : i32
    return %arg1, %c0_i32, %c0_i32_0 : i32, i32, i32
  }
  func.func @transform_7(%arg0: i32, %arg1: i32) -> (i32, i32, i32) {
    %c0_i32 = arith.constant 0 : i32
    %c0_i32_0 = arith.constant 0 : i32
    %c0_i32_1 = arith.constant 0 : i32
    return %arg1, %c0_i32, %c0_i32_0 : i32, i32, i32
  }
  func.func @transform_8(%arg0: i32, %arg1: i32) -> (i32, i32, i32) {
    %c0_i32 = arith.constant 0 : i32
    %c0_i32_0 = arith.constant 0 : i32
    %c0_i32_1 = arith.constant 0 : i32
    return %arg1, %c0_i32, %c0_i32_0 : i32, i32, i32
  }
  func.func @transform_9(%arg0: i32, %arg1: i32) -> (i32, i32, i32) {
    %c0_i32 = arith.constant 0 : i32
    %c0_i32_0 = arith.constant 0 : i32
    %c0_i32_1 = arith.constant 0 : i32
    return %arg1, %c0_i32, %c0_i32_0 : i32, i32, i32
  }
  func.func @transform_10(%arg0: i32, %arg1: i32) -> (i32, i32, i32) {
    %c0_i32 = arith.constant 0 : i32
    %c0_i32_0 = arith.constant 0 : i32
    %c0_i32_1 = arith.constant 0 : i32
    return %arg1, %c0_i32, %c0_i32_0 : i32, i32, i32
  }
  func.func @transform_11(%arg0: i32, %arg1: i32) -> (i32, i32, i32) {
    %c0_i32 = arith.constant 0 : i32
    %c0_i32_0 = arith.constant 0 : i32
    %c0_i32_1 = arith.constant 0 : i32
    return %arg1, %c0_i32, %c0_i32_0 : i32, i32, i32
  }
  func.func @transform_12(%arg0: i32, %arg1: i32) -> (i32, i32, i32) {
    %c0_i32 = arith.constant 0 : i32
    %c0_i32_0 = arith.constant 0 : i32
    %c0_i32_1 = arith.constant 0 : i32
    return %arg1, %c0_i32, %c0_i32_0 : i32, i32, i32
  }
  func.func @transform_13(%arg0: i32, %arg1: i32) -> (i32, i32, i32) {
    %c0_i32 = arith.constant 0 : i32
    %c0_i32_0 = arith.constant 0 : i32
    %c0_i32_1 = arith.constant 0 : i32
    return %arg1, %c0_i32, %c0_i32_0 : i32, i32, i32
  }
  func.func @transform_14(%arg0: i32, %arg1: i32) -> (i32, i32, i32) {
    %c0_i32 = arith.constant 0 : i32
    %c0_i32_0 = arith.constant 0 : i32
    %c0_i32_1 = arith.constant 0 : i32
    return %arg1, %c0_i32, %c0_i32_0 : i32, i32, i32
  }
  func.func @transform_15(%arg0: i32, %arg1: i32) -> (i32, i32, i32) {
    %c0_i32 = arith.constant 0 : i32
    %c0_i32_0 = arith.constant 0 : i32
    %c0_i32_1 = arith.constant 0 : i32
    return %arg1, %c0_i32, %c0_i32_0 : i32, i32, i32
  }
  func.func @transform_16(%arg0: i32, %arg1: i32) -> (i32, i32) {
    %c0_i32 = arith.constant 0 : i32
    %c0_i32_0 = arith.constant 0 : i32
    %c0_i32_1 = arith.constant 0 : i32
    return %c0_i32, %c0_i32_0 : i32, i32
  }
  func.func @transform_17(%arg0: i32, %arg1: i32) -> (i32, i32) {
    %c0_i32 = arith.constant 0 : i32
    %c0_i32_0 = arith.constant 0 : i32
    %c0_i32_1 = arith.constant 0 : i32
    return %c0_i32, %c0_i32_0 : i32, i32
  }
  func.func @transform_18(%arg0: i32, %arg1: i32) -> (i32, i32) {
    %c0_i32 = arith.constant 0 : i32
    %c0_i32_0 = arith.constant 0 : i32
    %c0_i32_1 = arith.constant 0 : i32
    return %c0_i32, %c0_i32_0 : i32, i32
  }
  func.func @transform_19(%arg0: i32, %arg1: i32) -> (i32, i32) {
    %c0_i32 = arith.constant 0 : i32
    %c0_i32_0 = arith.constant 0 : i32
    %c0_i32_1 = arith.constant 0 : i32
    return %c0_i32, %c0_i32_0 : i32, i32
  }
  func.func @transform_20(%arg0: i32, %arg1: i32) -> (i32, i32) {
    %c0_i32 = arith.constant 0 : i32
    %c0_i32_0 = arith.constant 0 : i32
    return %arg0, %c0_i32 : i32, i32
  }
  func.func @transform_21(%arg0: i32, %arg1: i32) -> (i32, i32, i32) {
    %c0_i32 = arith.constant 0 : i32
    %c0_i32_0 = arith.constant 0 : i32
    %c0_i32_1 = arith.constant 0 : i32
    return %arg0, %c0_i32, %c0_i32_0 : i32, i32, i32
  }
}

</mosaic_0001>

<bundles_post_ra>
// kernel: multi_task_bert_forward.1
= control target key start
LH: loop header
LB: loop body
LE: loop exit
PB: predicated region body
PF: predicated region fallthrough
CT: control target
= control target key end

     0   :  { %s3730_s0 = inlined_call_operand.vmem [shape: f32[16,128], index: 0, kind: input, shape index: {}, may-alias: {0,20}]   ;;  %s3731_s1 = inlined_call_operand.vmem [shape: f32[2,1,8], index: 1, kind: input, shape index: {}]   ;;  %s3732_s2 = inlined_call_operand.vmem [shape: f32[1,128], index: 2, kind: input, shape index: {}]   ;;  %s3733_s3 = inlined_call_operand.vmem [shape: f32[1,128], index: 3, kind: input, shape index: {}]   ;;  %s3734_s4 = inlined_call_operand.hbm [shape: bf16[2,128,768], index: 4, kind: input, shape index: {}]   ;;  %s3735_s5 = inlined_call_operand.vmem [shape: f32[2,1,768], index: 5, kind: input, shape index: {}]   ;;  %s3736_s6 = inlined_call_operand.vmem [shape: bf16[2,256,128], index: 6, kind: input, shape index: {}]   ;;  %s3737_s7 = inlined_call_operand.vmem [shape: f32[2,1,128], index: 7, kind: input, shape index: {}]   ;;  %s3738_s8 = inlined_call_operand.vmem [shape: f32[2,1,128], index: 8, kind: input, shape index: {}]   ;;  %s3739_s9 = inlined_call_operand.vmem [shape: f32[2,1,128], index: 9, kind: input, shape index: {}]   ;;  %s3740_s10 = inlined_call_operand.vmem [shape: bf16[2,128,128], index: 10, kind: input, shape index: {}]   ;;  %s3741_s11 = inlined_call_operand.vmem [shape: f32[2,1,128], index: 11, kind: input, shape index: {}]   ;;  %s3742_s12 = inlined_call_operand.hbm [shape: bf16[2,128,128], index: 12, kind: input, shape index: {}]   ;;  %s3743_s13 = inlined_call_operand.vmem [shape: f32[2,1,128], index: 13, kind: input, shape index: {}]   ;;  %s3744_s14 = inlined_call_operand.vmem [shape: f32[2,1,128], index: 14, kind: input, shape index: {}]   ;;  %s3745_s15 = inlined_call_operand.vmem [shape: f32[2,1,128], index: 15, kind: input, shape index: {}]   ;;  %s3746_s16 = inlined_call_operand.hbm [shape: bf16[128,128], index: 16, kind: input, shape index: {}]   ;;  %s3747_s17 = inlined_call_operand.vmem [shape: f32[1,128], index: 17, kind: input, shape index: {}]   ;;  %s3748_s18 = inlined_call_operand.hbm [shape: bf16[128,128], index: 18, kind: input, shape index: {}]   ;;  %s3749_s19 = inlined_call_operand.vmem [shape: f32[1,128], index: 19, kind: input, shape index: {}]   ;;  %s3750_s20 = inlined_call_operand.vmem [shape: f32[16,128], index: 20, kind: output, shape index: {0}, may-alias: {0,20}]   ;;  %s3751_s21 = inlined_call_operand.vmem [shape: f32[2,1,128], index: 21, kind: output, shape index: {1}]  }
   0x1   :  { %3762 = sst [smem:[#allocation22_spill]] %s3730_s0 }
   0x2   :  { %3763 = sst [smem:[#allocation23_spill]] %s3731_s1 }
   0x3   :  { %3764 = sst [smem:[#allocation24_spill]] %s3732_s2 }
   0x4   :  { %3765 = sst [smem:[#allocation25_spill]] %s3733_s3 }
   0x5   :  { %3766 = sst [smem:[#allocation26_spill]] %s3734_s4 }
   0x6   :  { %3767 = sst [smem:[#allocation27_spill]] %s3735_s5 }
   0x7   :  { %3768 = sst [smem:[#allocation28_spill]] %s3736_s6 }
   0x8   :  { %3769 = sst [smem:[#allocation29_spill]] %s3738_s8 }
   0x9   :  { %3770 = sst [smem:[#allocation30_spill]] %s3739_s9 }
   0xa   :  { %3771 = sst [smem:[#allocation31_spill]] %s3740_s10 }
   0xb   :  { %3772 = sst [smem:[#allocation32_spill]] %s3741_s11 }
   0xc   :  { %3773 = sst [smem:[#allocation33_spill]] %s3742_s12 }
   0xd   :  { %3774 = sst [smem:[#allocation34_spill]] %s3743_s13 }
   0xe   :  { %3775 = sst [smem:[#allocation35_spill]] %s3744_s14 }
   0xf   :  { %3776 = sst [smem:[#allocation36_spill]] %s3745_s15 }
  0x10   :  { %3777 = sst [smem:[#allocation37_spill]] %s3746_s16 }
  0x11   :  { %3778 = sst [smem:[#allocation38_spill]] %s3747_s17 }
  0x12   :  { %3779 = sst [smem:[#allocation39_spill]] %s3748_s18 }
  0x13   :  { %3780 = sst [smem:[#allocation40_spill]] %s3749_s19 }
  0x14   :  { %3781 = sst [smem:[#allocation41_spill]] %s3750_s20 }
  0x15   :  { %3782 = sst [smem:[#allocation42_spill]] %s3751_s21 }
  0x16   :  { %27 = vsyncpa [#allocation3], 0 }
  0x17   :  { %29 = vsyncpa [#allocation3 + $0x1], 0 }
  0x18   :  { %30 = vsyncpa [#allocation5], 0 }
  0x19   :  { %32 = vsyncpa [#allocation5 + $0x1], 0 }
  0x1a   :  { %33 = vsyncpa [#allocation8], 0  ;;  %s3275_s2 = smov 0   ;;  %s3277_s25 = smov 0  }
  0x1b   :  { %s3279_s26 = smov 0   ;;  %s3281_s27 = smov 0  }
  0x1c   :  { %s3283_s3 = smov 0   ;;  %s3285_s28 = smov 0  }
  0x1d   :  { %s3287_s29 = smov 0   ;;  %s3289_s0 = smov 0  }
  0x1e LB: > { %3783 = sst [smem:[#allocation13_spill]] %s3132_s25  ;;  %s3752_s4 = sadd.s32 4294967295, %s3156_s0   ;;  %s3156_s0 = sphi %s3289_s0, %s39_s0   ;;  %s3152_s29 = sphi %s3287_s29, %s3840_s29   ;;  %s3148_s28 = sphi %s3285_s28, %s3839_s28   ;;  %s3144_s3 = sphi %s3283_s3, %s3838_s3   ;;  %s3140_s27 = sphi %s3281_s27, %s3837_s27   ;;  %s3136_s26 = sphi %s3279_s26, %s3836_s26   ;;  %s3132_s25 = sphi %s3277_s25, %s3835_s25   ;;  %s3128_s2 = sphi %s3275_s2, %s3834_s2  }
  0x1f   : > { %3784 = sst [smem:[#allocation14_spill]] %s3136_s26  ;;  %p165_p0 = scmp.ne.s32.totalorder %s3132_s25, %s3128_s2 }
  0x20   : > { %3785 = sst [smem:[#allocation15_spill]] %s3148_s28  ;;  %p3317_p1 = scmp.eq.s32.totalorder %s3752_s4, 0 }
  0x21   : > { %3786 = sst [smem:[#allocation16_spill]] %s3152_s29  ;;  %p2316_p2 = scmp.ge.s32.totalorder %s3156_s0, 1 }
  0x22   : > { %3787 = sst [smem:[#allocation17_spill]] %s3156_s0  ;;  %p598_p3 = scmp.lt.s32.totalorder %s3156_s0, 5 }
  0x23   : > { %p3325_p4 = por %p3317_p1, %p165_p0  ;;  %s3790_s16 = sld [smem:[#allocation37_spill]] }
  0x24   : > { %p3332_p5 = pnand %p2316_p2, %p598_p3  ;;  %s3158_s2 = smov [#allocation6]  }
  0x25   : > { %s617_s4 = sshll.u32 %s3158_s2, 4  ;;  %s3792_s18 = sld [smem:[#allocation39_spill]]  ;;  %s618_s4 = int_to_ptr.vmem [resolvable:$true] %s617_s4 }
  0x26   : > { %p2840_p6 = pneg %p3332_p5  ;;  %s3753_s19 = smov 64  }
  0x27   : > { %s3754_s17 = smov 4   ;;  %s3161_s2 = smov [#allocation7]  }
  0x28   : > { %p2841_p7 = pnand %p2840_p6, %p3317_p1  ;;  %s634_s21 = sshll.u32 %s3161_s2, 4  ;;  %s635_s21 = int_to_ptr.vmem [resolvable:$true] %s634_s21 }
  0x29   : > { %s615_s1 = sshll.u32 %s3790_s16, 4  ;;  %s48_s22 = sadd.s32 1, %s3148_s28  ;;  %s616_s1 = int_to_ptr.hbm [resolvable:$true] %s615_s1 }
  0x2a   : > { %2843 = dma.hbm_to_vmem [thread:$0]  (!%p2841_p7), %s616_s1, 1024, %s618_s4, [#allocation5], %s3753_s19, %s3753_s19, %s3754_s17  }
  0x2b   : > { %s632_s16 = sshll.u32 %s3792_s18, 4  ;;  %s51_s23 = sadd.s32 1, %s3152_s29  ;;  %s633_s16 = int_to_ptr.hbm [resolvable:$true] %s632_s16 }
  0x2c   : > { %2846 = dma.hbm_to_vmem [thread:$0]  (!%p2841_p7), %s633_s16, 1024, %s635_s21, [#allocation8], %s3753_s19, %s3753_s19, %s3754_s17  }
  0x2d   : > { %p49_p8 = scmp.ge.s32.totalorder %s48_s22, 2  ;;  %s152_s18 = sadd.s32 1, %s3136_s26 }
  0x2e   : > { %p159_p9 = scmp.ne.s32.totalorder %s3136_s26, %s3132_s25  ;;  %p160_p10 = scmp.eq.s32.totalorder %s3156_s0, 0 }
  0x2f   : > { %s3842_s22 = smov (%p49_p8, %s48_s22), 0  ;;  %s3844_s23 = smov (!%p49_p8, %s51_s23), %s3152_s29 }
  0x30   : > { %3793 = sst [smem:[#allocation18_spill]] %s3842_s22  ;;  %s149_s4 = ssub.s32 %s3148_s28, %s3842_s22 }
  0x31   : > { %p161_p11 = por %p160_p10, %p159_p9  ;;  %p53_p12 = scmp.ge.s32.totalorder %s3844_s23, 2 }
  0x32   : > { %p150_p13 = scmp.eq.s32.totalorder %s149_s4, 0  ;;  %p2856_p0 = scmp.lt.s32.totalorder %s3156_s0, 4 }
  0x33   : > { %s664_s1 = sand.u32 1, %s3136_s26   ;;  %s3846_s23 = smov (%p53_p12, %s3844_s23), 0 }
  0x34   : > { %3794 = sst [smem:[#allocation19_spill]] %s3846_s23  ;;  %s2824_s21 = smul.u32 384, %s664_s1 }
  0x35   : > { %s3365_s16 = scalar_select %p150_p13, %s3136_s26, %s152_s18  }
  0x36   : > { %s2825_s2 = smul.u32 384, %s3148_s28  ;;  %p3368_p2 = pnand %p2856_p0, %p161_p11 }
  0x37   : > { %3795 = sst [smem:[#allocation20_spill]] %s3365_s16  ;;  %s668_s15 = scalar_lea.vmem [#allocation2], %s2824_s21 }
  0x38   : > { %s3797_s22 = sld [smem:[#allocation26_spill]]  ;;  %s676_s4 = sshll.u32 %s668_s15, 4  ;;  %s677_s4 = int_to_ptr.vmem [resolvable:$true] %s676_s4 }
  0x39   : > { %s733_s18 = sand.u32 1, %s3156_s0   ;;  %s665_s23 = scalar_lea.sflag [#allocation3], %s664_s1 }
  0x3a   : > { %s3162_s16 = smov 384   ;;  %s3163_s26 = smov 24  }
  0x3b   : > { %s2321_s13 = sshll.u32 %s664_s1, 6  ;;  %s2725_s10 = sshll.u32 %s3148_s28, 6 }
  0x3c   : > { %s3798_s12 = sld [smem:[#allocation33_spill]]  ;;  %s737_s29 = scalar_lea.vmem [#allocation4], %s2321_s13 }
  0x3d   : > { %s734_s15 = scalar_lea.sflag [#allocation5], %s733_s18 }
  0x3e   : > { %s673_s20 = scalar_lea.hbm %s3797_s22, %s2825_s2  ;;  %s745_s22 = sshll.u32 %s737_s29, 4  ;;  %s746_s22 = int_to_ptr.vmem [resolvable:$true] %s745_s22 }
  0x3f   : > { %s674_s14 = sshll.u32 %s673_s20, 4  ;;  %s3799_s20 = smov 4   ;;  %s675_s14 = int_to_ptr.hbm [resolvable:$true] %s674_s14 }
  0x40   : > { %2850 = dma.hbm_to_vmem [thread:$0]  (!%p3368_p2), %s675_s14, 6144, %s677_s4, %s665_s23, %s3162_s16, %s3162_s16, %s3163_s26  }
  0x41   : > { %s3800_s2 = smov 64   ;;  %775 = sbr.rel (%p3332_p5) target bundleno = 2358 (0x936), region = 100 }
  0x42   : > { %s742_s17 = scalar_lea.hbm %s3798_s12, %s2725_s10 }
  0x43   : > { %s743_s21 = sshll.u32 %s742_s17, 4  ;;  %s744_s21 = int_to_ptr.hbm [resolvable:$true] %s743_s21 }
  0x44   : > { %2853 = dma.hbm_to_vmem [thread:$0]  (!%p3368_p2), %s744_s21, 1024, %s746_s22, %s734_s15, %s3800_s2, %s3800_s2, %s3799_s20  }
  0x46   : > { %s777_s14 = sand.u32 1, %s3132_s25  }
  0x47   : > { %s2826_s26 = smul.u32 384, %s777_s14  ;;  %s778_s9 = scalar_lea.sflag [#allocation3], %s777_s14 }
  0x49   : > { %s3390_s10 = scalar_lea.vmem [#allocation2], %s2826_s26 }
  0x4a   : > { %3111 = dma.done.wait (%p3325_p4), %s778_s9, 6144  }
  0x4b   : > { %3113 = vsyncadd (%p3325_p4), %s778_s9, 4294961152  ;;  %s3801_s11 = sadd.s32 4294967295, %s3156_s0   ;;  %s2325_s19 = sshll.u32 %s777_s14, 6 }
  0x4c   : > { %s787_s13 = sand.u32 1, %s3801_s11   ;;  %s3398_s24 = scalar_lea.vmem [#allocation4], %s2325_s19 }
  0x4d   : > { %s788_s23 = scalar_lea.sflag [#allocation5], %s787_s13  ;;  %3802 = sst [smem:[#allocation21_spill]] %s3398_s24 }
  0x4e   : > { %3115 = dma.done.wait (%p3325_p4), %s788_s23, 1024  }
  0x4f   : > { %3117 = vsyncadd (%p3325_p4), %s788_s23, 4294966272 }
  0x50   : > { %3119 = dma.done.wait (%p3317_p1), [#allocation5], 1024  }
  0x51   : > { %3121 = vsyncadd (%p3317_p1), [#allocation5], 4294966272 }
  0x52   : > { %3123 = dma.done.wait (%p3317_p1), [#allocation8], 1024  }
  0x53   : > { %3125 = vsyncadd (%p3317_p1), [#allocation8], 4294966272  ;;  %p910_p3 = scmp.lt.s32.totalorder %s3144_s3, 1  ;;  %p917_p5 = scmp.lt.s32.totalorder %s3140_s27, 1  ;;  %v960_v0 = vlaneseq  ;;  %v3164_v2 = vmov 0.0  }
  0x54   : > { %s3804_s22 = sld [smem:[#allocation22_spill]]  ;;  %p2335_p1 = scmp.ne.s32.totalorder %s3140_s27, 0 }
  0x55   : > { %s3848_s3 = smov (!%p910_p3, %s3144_s3), 1  ;;  %v961_v1 = vand.u32 127, %v960_v0  ;;  %s3805_s13 = sld [smem:[#allocation27_spill]] }
  0x56   : > { %s3418_s5 = scalar_select %p917_p5, %s3140_s27, 1 }
  0x57   : > { %s2328_s30 = sshll.u32 %s3848_s3, 3  ;;  %vm962_vm0 = vcmp.lt.s32.totalorder %v961_v1, 32  ;;  %s3806_s6 = sld [smem:[#allocation28_spill]] }
  0x58   : > { %s2827_s15 = smul.u32 6, %s3418_s5  ;;  %v3429_v3 = vsel %vm962_vm0, 1.0, %v3164_v2  ;;  %s2726_s20 = sshll.u32 %s3418_s5, 7 }
  0x59   : > { %s2727_s2 = sshll.u32 %s3418_s5, 6  ;;  %s3809_s25 = sld [smem:[#allocation32_spill]] }
  0x5a   : > { %s913_s21 = scalar_lea.vmem %s3804_s22, %s2328_s30  ;;  %s3811_s1 = sld [smem:[#allocation34_spill]] }
  0x5b   : > { %s3439_s19 = scalar_lea.vmem %s3805_s13, %s2827_s15  ;;  %s3810_s13 = sld [smem:[#allocation31_spill]] }
  0x5c   : > { %s3812_s29 = sld [smem:[#allocation35_spill]] }
  0x5d   : > { %s3444_s16 = scalar_lea.vmem %s3806_s6, %s2726_s20  ;;  %s3813_s22 = sld [smem:[#allocation36_spill]] }
  0x5e   : > { %s3815_s11 = sld [smem:[#allocation42_spill]] }
  0x5f   : > { %s942_s9 = scalar_lea.vmem %s3809_s25, %s3418_s5  ;;  %s3814_s25 = sld [smem:[#allocation41_spill]] }
  0x60   : > { %s945_s6 = scalar_lea.vmem %s3811_s1, %s3418_s5  ;;  %s3817_s23 = sld [smem:[#allocation25_spill]] (!%p2335_p1) }
  0x61   : > { %s3462_s0 = scalar_lea.vmem %s3810_s13, %s2727_s2  ;;  %968 = sbr.rel (%p2335_p1) target bundleno = 372 (0x174), region = 120 }
  0x62   : > { %s948_s8 = scalar_lea.vmem %s3812_s29, %s3418_s5 }
  0x63   : > { %s951_s28 = scalar_lea.vmem %s3813_s22, %s3418_s5 }
  0x64   : > { %s958_s13 = scalar_lea.vmem %s3815_s11, %s3848_s3 }
  0x65   : > { %s3479_s14 = scalar_lea.vmem %s3814_s25, %s2328_s30 }
  0x66   : > { %v969_v4 = vld [vmem:[%s913_s21] sm:$0xff]  ;;  %s3816_s21 = sld [smem:[#allocation24_spill]] }
  0x67   : > { %972 = vadd.xlane.f32.xlu0 %v969_v4  ;;  %v2931_v21 = vld [vmem:[%s3817_s23] ss:$0 sm:$0xff] }
  0x6c   : > { %v2930_v19 = vld [vmem:[%s3816_s21] ss:$0 sm:$0xff] }
  0xda   : > { %v973_v5 = vpop.xlane.xlu0 %972 }
  0xdb   : > { %v974_v6 = vmul.f32 0.03125, %v973_v5 }
  0xdd   : > { %v975_v7 = vsub.f32 %v969_v4, %v974_v6 }
  0xdf   : > { %v976_v8 = vmul.f32 %v3429_v3, %v975_v7 }
  0xe1   : > { %v977_v9 = vmul.f32 %v976_v8, %v976_v8 }
  0xe3   : > { %978 = vadd.xlane.f32.xlu0 %v977_v9 }
 0x156   : > { %v979_v10 = vpop.xlane.xlu0 %978 }
 0x157   : > { %v980_v11 = vmul.f32 0.03125, %v979_v10 }
 0x159   : > { %v981_v12 = vadd.f32 1e-12, %v980_v11 }
 0x15b   : > { %2932 = vrsqrt.f32 %v981_v12  ;;  %vm988_vm2 = vweird.f32 %v981_v12 }
 0x161   : > { %v2933_v13 = vpop.eup %2932 }
 0x162   : > { %v983_v14 = vmul.f32 %v2933_v13, %v981_v12  ;;  %vm989_vm1 = vweird.f32 %v2933_v13 }
 0x163   : > { %vm990_vm3 = vmor %vm988_vm2, %vm989_vm1 }
 0x164   : > { %v984_v15 = vmul.f32 %v2933_v13, %v983_v14 }
 0x166   : > { %v985_v16 = vmul.f32 0.5, %v984_v15 }
 0x168   : > { %v986_v17 = vsub.f32 1.5, %v985_v16 }
 0x16a   : > { %v987_v18 = vmul.f32 %v2933_v13, %v986_v17 }
 0x16c   : > { %v991_v20 = vsel %vm990_vm3, %v2933_v13, %v987_v18 }
 0x16d   : > { %v992_v22 = vmul.f32 %v991_v20, %v976_v8 }
 0x16f   : > { %v996_v23 = vmul.f32 %v2930_v19, %v992_v22 }
 0x171   : > { %v1000_v24 = vadd.f32 %v2931_v21, %v996_v23 }
 0x173   : > { %1001 = vst [vmem:[%s3479_s14] sm:$0xff] %v1000_v24 }
 0x174 PF: > { %v2514_v25 = vld [vmem:[%s3390_s10 + $0x158] sm:$0xf]  ;;  %v2774_v26 = vld [vmem:[%s3390_s10 + $0x16c] sm:$0xf0]  ;;  %v2490_v27 = vld [vmem:[%s3390_s10 + $0x128] sm:$0xf]  ;;  %s3820_s12 = scalar_lea.vmem %s3737_s7, %s3418_s5 }
 0x175   : > { %v2515_v28 = vor.u32 %v2774_v26, %v2514_v25  ;;  %v2768_v29 = vld [vmem:[%s3390_s10 + $0x13c] sm:$0xf0]  ;;  %v2771_v30 = vld [vmem:[%s3390_s10 + $0x15c] sm:$0xf]  ;;  %v2516_v31 = vld [vmem:[%s3390_s10 + $0x170] sm:$0xf0] }
 0x176   : > { %v2491_v32 = vor.u32 %v2768_v29, %v2490_v27  ;;  %v2466_v33 = vld [vmem:[%s3390_s10 + $0xf8] sm:$0xf]  ;;  %v2519_v34 = vor.u32 %v2771_v30, %v2516_v31  ;;  %v2765_v35 = vld [vmem:[%s3390_s10 + $0x12c] sm:$0xf]  ;;  %v2492_v36 = vld [vmem:[%s3390_s10 + $0x140] sm:$0xf0] }
 0x177   : > { %1333 = vmatpush.bf16.msra.mxu2 %v2515_v28  ;;  %v2762_v37 = vld [vmem:[%s3390_s10 + $0x10c] sm:$0xf0]  ;;  %v2773_v39 = vld [vmem:[%s3390_s10 + $0x164] sm:$0xf0]  ;;  %v2495_v40 = vor.u32 %v2765_v35, %v2492_v36  ;;  %v2759_v42 = vld [vmem:[%s3390_s10 + $0xfc] sm:$0xf] }
 0x178   : > { %v2506_v38 = vld [vmem:[%s3390_s10 + $0x150] sm:$0xf]  ;;  %1346 = vmatpush.bf16.msra.mxu3 %v2519_v34  ;;  %v2468_v43 = vld [vmem:[%s3390_s10 + $0x110] sm:$0xf0]  ;;  %v2482_v44 = vld [vmem:[%s3390_s10 + $0x120] sm:$0xf]  ;;  %v2467_v46 = vor.u32 %v2762_v37, %v2466_v33 }
 0x179   : > { %v2507_v41 = vor.u32 %v2773_v39, %v2506_v38  ;;  %v2767_v45 = vld [vmem:[%s3390_s10 + $0x134] sm:$0xf0]  ;;  %v2442_v47 = vld [vmem:[%s3390_s10 + $0xc8] sm:$0xf]  ;;  %v2756_v49 = vld [vmem:[%s3390_s10 + $0xdc] sm:$0xf0]  ;;  %v2471_v52 = vor.u32 %v2759_v42, %v2468_v43 }
 0x17a   : > { %v2483_v48 = vor.u32 %v2767_v45, %v2482_v44  ;;  %v2458_v50 = vld [vmem:[%s3390_s10 + $0xf0] sm:$0xf]  ;;  %v2761_v51 = vld [vmem:[%s3390_s10 + $0x104] sm:$0xf0]  ;;  %v2753_v53 = vld [vmem:[%s3390_s10 + $0xcc] sm:$0xf]  ;;  %v2443_v55 = vor.u32 %v2756_v49, %v2442_v47 }
 0x17b   : > { %1334 = vmatpush.bf16.msra.mxu2 %v2491_v32  ;;  %1307 = vmatpush.bf16.msra.mxu0 %v2507_v41  ;;  %v2444_v54 = vld [vmem:[%s3390_s10 + $0xe0] sm:$0xf0]  ;;  %v2418_v56 = vld [vmem:[%s3390_s10 + $0x98] sm:$0xf]  ;;  %v2750_v57 = vld [vmem:[%s3390_s10 + $0xac] sm:$0xf0]  ;;  %v2459_v58 = vor.u32 %v2761_v51, %v2458_v50 }
 0x17c   : > { %1347 = vmatpush.bf16.msra.mxu3 %v2495_v40  ;;  %v2434_v59 = vld [vmem:[%s3390_s10 + $0xc0] sm:$0xf]  ;;  %v2755_v60 = vld [vmem:[%s3390_s10 + $0xd4] sm:$0xf0]  ;;  %v2770_v61 = vld [vmem:[%s3390_s10 + $0x154] sm:$0xf]  ;;  %v2447_v62 = vor.u32 %v2753_v53, %v2444_v54  ;;  %v2419_v4 = vor.u32 %v2750_v57, %v2418_v56 }
 0x17d   : > { %v2508_v63 = vld [vmem:[%s3390_s10 + $0x168] sm:$0xf0]  ;;  %v2747_v0 = vld [vmem:[%s3390_s10 + $0x9c] sm:$0xf]  ;;  %v2420_v1 = vld [vmem:[%s3390_s10 + $0xb0] sm:$0xf0]  ;;  %v2435_v6 = vor.u32 %v2755_v60, %v2434_v59 }
 0x17e   : > { %v2511_v2 = vor.u32 %v2770_v61, %v2508_v63  ;;  %v2394_v5 = vld [vmem:[%s3390_s10 + $0x68] sm:$0xf]  ;;  %v2764_v7 = vld [vmem:[%s3390_s10 + $0x124] sm:$0xf]  ;;  %v2484_v8 = vld [vmem:[%s3390_s10 + $0x138] sm:$0xf0]  ;;  %v2423_v13 = vor.u32 %v2747_v0, %v2420_v1 }
 0x17f   : > { %1335 = vmatpush.bf16.msra.mxu2 %v2467_v46  ;;  %1308 = vmatpush.bf16.msra.mxu0 %v2483_v48  ;;  %v2744_v9 = vld [vmem:[%s3390_s10 + $0x7c] sm:$0xf0]  ;;  %v2410_v10 = vld [vmem:[%s3390_s10 + $0x90] sm:$0xf]  ;;  %v2749_v11 = vld [vmem:[%s3390_s10 + $0xa4] sm:$0xf0]  ;;  %v2487_v12 = vor.u32 %v2764_v7, %v2484_v8 }
 0x180   : > { %1348 = vmatpush.bf16.msra.mxu3 %v2471_v52  ;;  %1320 = vmatpush.bf16.msra.mxu1 %v2511_v2  ;;  %v2758_v14 = vld [vmem:[%s3390_s10 + $0xf4] sm:$0xf]  ;;  %v2460_v15 = vld [vmem:[%s3390_s10 + $0x108] sm:$0xf0]  ;;  %v2396_v17 = vld [vmem:[%s3390_s10 + $0x80] sm:$0xf0]  ;;  %v2395_v18 = vor.u32 %v2744_v9, %v2394_v5  ;;  %v2411_v21 = vor.u32 %v2749_v11, %v2410_v10 }
 0x181   : > { %v2741_v16 = vld [vmem:[%s3390_s10 + $0x6c] sm:$0xf]  ;;  %v2370_v19 = vld [vmem:[%s3390_s10 + $0x38] sm:$0xf]  ;;  %v2738_v20 = vld [vmem:[%s3390_s10 + $0x4c] sm:$0xf0]  ;;  %v2463_v25 = vor.u32 %v2758_v14, %v2460_v15 }
 0x182   : > { %v2735_v22 = vld [vmem:[%s3390_s10 + $0x3c] sm:$0xf]  ;;  %v2386_v23 = vld [vmem:[%s3390_s10 + $0x60] sm:$0xf]  ;;  %v2743_v24 = vld [vmem:[%s3390_s10 + $0x74] sm:$0xf0]  ;;  %v2399_v26 = vor.u32 %v2741_v16, %v2396_v17  ;;  %v2371_v34 = vor.u32 %v2738_v20, %v2370_v19 }
 0x183   : > { %1336 = vmatpush.bf16.msra.mxu2 %v2443_v55  ;;  %1309 = vmatpush.bf16.msra.mxu0 %v2459_v58  ;;  %v2372_v27 = vld [vmem:[%s3390_s10 + $0x50] sm:$0xf0]  ;;  %v2752_v28 = vld [vmem:[%s3390_s10 + $0xc4] sm:$0xf]  ;;  %v2436_v29 = vld [vmem:[%s3390_s10 + $0xd8] sm:$0xf0]  ;;  %v2387_v35 = vor.u32 %v2743_v24, %v2386_v23 }
 0x184   : > { %1349 = vmatpush.bf16.msra.mxu3 %v2447_v62  ;;  %1321 = vmatpush.bf16.msra.mxu1 %v2487_v12  ;;  %v2346_v30 = vld [vmem:[%s3390_s10 + $0x8] sm:$0xf]  ;;  %v2732_v31 = vld [vmem:[%s3390_s10 + $0x1c] sm:$0xf0]  ;;  %v2362_v32 = vld [vmem:[%s3390_s10 + $0x30] sm:$0xf]  ;;  %v2439_v36 = vor.u32 %v2752_v28, %v2436_v29  ;;  %v2375_v37 = vor.u32 %v2735_v22, %v2372_v27 }
 0x185   : > { %v2737_v33 = vld [vmem:[%s3390_s10 + $0x44] sm:$0xf0]  ;;  %v2746_v38 = vld [vmem:[%s3390_s10 + $0x94] sm:$0xf]  ;;  %v2412_v39 = vld [vmem:[%s3390_s10 + $0xa8] sm:$0xf0]  ;;  %v2347_v42 = vor.u32 %v2732_v31, %v2346_v30 }
 0x186   : > { %v2729_v40 = vld [vmem:[%s3390_s10 + $0xc] sm:$0xf]  ;;  %v2348_v41 = vld [vmem:[%s3390_s10 + $0x20] sm:$0xf0]  ;;  %v2363_v44 = vor.u32 %v2737_v33, %v2362_v32  ;;  %v2338_v45 = vld [vmem:[%s3390_s10] sm:$0xf]  ;;  %v2415_v47 = vor.u32 %v2746_v38, %v2412_v39 }
 0x187   : > { %1337 = vmatpush.bf16.msra.mxu2 %v2419_v4  ;;  %1310 = vmatpush.bf16.msra.mxu0 %v2435_v6  ;;  %v3551_v43 = vld [vmem:[%s3479_s14] sm:$0xff]  ;;  %v2731_v46 = vld [vmem:[%s3390_s10 + $0x14] sm:$0xf0]  ;;  %v2351_v48 = vor.u32 %v2729_v40, %v2348_v41  ;;  %v2388_v50 = vld [vmem:[%s3390_s10 + $0x78] sm:$0xf0]  ;;  %s3818_s4 = sld [smem:[#allocation23_spill]] }
 0x188   : > { %1350 = vmatpush.bf16.msra.mxu3 %v2423_v13  ;;  %1322 = vmatpush.bf16.msra.mxu1 %v2463_v25  ;;  %v2740_v49 = vld [vmem:[%s3390_s10 + $0x64] sm:$0xf]  ;;  %v3559_v51 = vpack.c.bf16 %v3551_v43, %v3551_v43  ;;  %v2339_v52 = vor.u32 %v2731_v46, %v2338_v45  ;;  %v2734_v54 = vld [vmem:[%s3390_s10 + $0x34] sm:$0xf]  ;;  %v2364_v55 = vld [vmem:[%s3390_s10 + $0x48] sm:$0xf0] }
 0x189   : > { %v2391_v53 = vor.u32 %v2740_v49, %v2388_v50  ;;  %v2367_v56 = vor.u32 %v2734_v54, %v2364_v55  ;;  %v2728_v57 = vld [vmem:[%s3390_s10 + $0x4] sm:$0xf]  ;;  %v2340_v58 = vld [vmem:[%s3390_s10 + $0x18] sm:$0xf0]  ;;  %v2775_v19 = vld [vmem:[%s3390_s10 + $0x174] sm:$0xf0] }
 0x18a   : > { %v2343_v59 = vor.u32 %v2728_v57, %v2340_v58  ;;  %v3570_v60 = vld [vmem:[%s3439_s19] sm:$0x3f]  ;;  %v2498_v20 = vld [vmem:[%s3390_s10 + $0x130] sm:$0xf]  ;;  %v2769_v22 = vld [vmem:[%s3390_s10 + $0x144] sm:$0xf0] }
 0x18b   : > { %1338 = vmatpush.bf16.msra.mxu2 %v2395_v18  ;;  %1311 = vmatpush.bf16.msra.mxu0 %v2411_v21  ;;  %v1057_v61 = vperm.slane %v3570_v60, 2  ;;  %v1058_v63 = vperm.slane %v3570_v60, 3  ;;  %v1055_v1 = vperm.slane %v3570_v60, 0  ;;  %v1056_v15 = vperm.slane %v3570_v60, 1  ;;  %v2522_v18 = vld [vmem:[%s3390_s10 + $0x160] sm:$0xf] }
 0x18c   : > { %1351 = vmatpush.bf16.msra.mxu3 %v2399_v26  ;;  %1323 = vmatpush.bf16.msra.mxu1 %v2439_v36  ;;  %v2523_v21 = vor.u32 %v2775_v19, %v2522_v18  ;;  %v2499_v23 = vor.u32 %v2769_v22, %v2498_v20  ;;  %v2772_v24 = vld [vmem:[%s3390_s10 + $0x164] sm:$0xf]  ;;  %v2524_v25 = vld [vmem:[%s3390_s10 + $0x178] sm:$0xf0]  ;;  %v2474_v26 = vld [vmem:[%s3390_s10 + $0x100] sm:$0xf] }
 0x18d   : > { %v2763_v27 = vld [vmem:[%s3390_s10 + $0x114] sm:$0xf0]  ;;  %v2527_v28 = vor.u32 %v2772_v24, %v2524_v25  ;;  %v2766_v29 = vld [vmem:[%s3390_s10 + $0x134] sm:$0xf]  ;;  %v2500_v30 = vld [vmem:[%s3390_s10 + $0x148] sm:$0xf0]  ;;  %s3819_s17 = scalar_lea.vmem %s3818_s4, %s3848_s3 }
 0x18e   : > { %v2503_v31 = vor.u32 %v2766_v29, %v2500_v30  ;;  %v2934_v32 = vld [vmem:[%s3819_s17] ss:$0 sm:$0xff]  ;;  %v2475_v33 = vor.u32 %v2763_v27, %v2474_v26  ;;  %v2757_v38 = vld [vmem:[%s3390_s10 + $0xe4] sm:$0xf0]  ;;  %vm1437_vm4 = vcmask 64512   ;;  %vm1454_vm5 = vcmask 1043456  }
 0x18f   : > { %1339 = vmatpush.bf16.msra.mxu2 %v2371_v34  ;;  %1312 = vmatpush.bf16.msra.mxu0 %v2387_v35  ;;  %v2760_v34 = vld [vmem:[%s3390_s10 + $0x104] sm:$0xf]  ;;  %v2476_v35 = vld [vmem:[%s3390_s10 + $0x118] sm:$0xf0]  ;;  %v2452_v45 = vld [vmem:[%s3390_s10 + $0xe8] sm:$0xf0] }
 0x190   : > { %1352 = vmatpush.bf16.msra.mxu3 %v2375_v37  ;;  %1324 = vmatpush.bf16.msra.mxu1 %v2415_v47  ;;  %v2450_v37 = vld [vmem:[%s3390_s10 + $0xd0] sm:$0xf]  ;;  %v2479_v40 = vor.u32 %v2760_v34, %v2476_v35  ;;  %v2426_v46 = vld [vmem:[%s3390_s10 + $0xa0] sm:$0xf]  ;;  %v2751_v47 = vld [vmem:[%s3390_s10 + $0xb4] sm:$0xf0] }
 0x191   : > { %v2427_v50 = vor.u32 %v2751_v47, %v2426_v46  ;;  %v2402_v55 = vld [vmem:[%s3390_s10 + $0x70] sm:$0xf]  ;;  %s3822_s26 = sld [smem:[#allocation29_spill]]  ;;  %p2658_p4 = scmp.ne.s32.totalorder %s3140_s27, 1 }
 0x192   : > { %s3824_s11 = sld [smem:[#allocation30_spill]] }
 0x193   : > { %1340 = vmatpush.bf16.msra.mxu2 %v2347_v42  ;;  %1313 = vmatpush.bf16.msra.mxu0 %v2363_v44  ;;  %v2451_v42 = vor.u32 %v2757_v38, %v2450_v37  ;;  %v2754_v44 = vld [vmem:[%s3390_s10 + $0xd4] sm:$0xf]  ;;  %v2783_v38 = vld [vmem:[%s3444_s16 + $0x38] sm:$0xff]  ;;  %s3831_s18 = sld [smem:[#allocation40_spill]] (!%p2658_p4) }
 0x194   : > { %1353 = vmatpush.bf16.msra.mxu3 %v2351_v48  ;;  %1325 = vmatpush.bf16.msra.mxu1 %v2391_v53  ;;  %v2455_v49 = vor.u32 %v2754_v44, %v2452_v45  ;;  %v2428_v53 = vld [vmem:[%s3390_s10 + $0xb8] sm:$0xf0]  ;;  %v2789_v44 = vld [vmem:[%s3444_s16 + $0x68] sm:$0xff]  ;;  %v2780_v45 = vld [vmem:[%s3444_s16 + $0x20] sm:$0xff] }
 0x196   : > { %1341 = vmatmul.bf16.vlgmr.msra.gmra.mxu2 %v3559_v51 }
 0x197   : > { %1314 = vmatpush.bf16.msra.mxu0 %v2339_v52  ;;  %1354 = vmatmul.bf16.vlgmr.msra.gmra.mxu3 %v3559_v51  ;;  %v2748_v52 = vld [vmem:[%s3390_s10 + $0xa4] sm:$0xf]  ;;  %s3823_s25 = scalar_lea.vmem %s3822_s26, %s3418_s5 }
 0x198   : > { %1326 = vmatpush.bf16.msra.mxu1 %v2367_v56  ;;  %v2745_v56 = vld [vmem:[%s3390_s10 + $0x84] sm:$0xf0]  ;;  %v2431_v57 = vor.u32 %v2748_v52, %v2428_v53  ;;  %s3825_s24 = scalar_lea.vmem %s3824_s11, %s3418_s5 }
 0x199   : > { %v2403_v58 = vor.u32 %v2745_v56, %v2402_v55  ;;  %v2777_v53 = vld [vmem:[%s3444_s16 + $0x8] sm:$0xff] }
 0x19a   : > { %1315 = vmatmul.bf16.vlgmr.msra.gmra.mxu0 %v3559_v51 }
 0x19b   : > { %1359 = vmatpush.bf16.msrb.mxu0 %v2523_v21 }
 0x19c   : > { %1327 = vmatpush.bf16.msra.mxu1 %v2343_v59  ;;  %v2742_v59 = vld [vmem:[%s3390_s10 + $0x74] sm:$0xf] }
 0x19f   : > { %1328 = vmatmul.bf16.vlgmr.msra.gmra.mxu1 %v3559_v51  ;;  %1360 = vmatpush.bf16.msrb.mxu0 %v2499_v23 }
 0x1a0   : > { %1372 = vmatpush.bf16.msrb.mxu1 %v2527_v28  ;;  %v1059_v28 = vperm.slane %v3570_v60, 4 }
 0x1a3   : > { %1361 = vmatpush.bf16.msrb.mxu0 %v2475_v33 }
 0x1a4   : > { %1373 = vmatpush.bf16.msrb.mxu1 %v2503_v31 }
 0x1a7   : > { %1362 = vmatpush.bf16.msrb.mxu0 %v2451_v42 }
 0x1a8   : > { %1374 = vmatpush.bf16.msrb.mxu1 %v2479_v40  ;;  %v2782_v40 = vld [vmem:[%s3444_s16 + $0x30] sm:$0xff] }
 0x1ab   : > { %1363 = vmatpush.bf16.msrb.mxu0 %v2427_v50  ;;  %v2778_v50 = vld [vmem:[%s3444_s16 + $0x10] sm:$0xff] }
 0x1ac   : > { %1375 = vmatpush.bf16.msrb.mxu1 %v2455_v49  ;;  %v2779_v49 = vld [vmem:[%s3444_s16 + $0x18] sm:$0xff] }
 0x1af   : > { %1364 = vmatpush.bf16.msrb.mxu0 %v2403_v58  ;;  %v2776_v58 = vld [vmem:[%s3444_s16] sm:$0xff] }
 0x1b0   : > { %1376 = vmatpush.bf16.msrb.mxu1 %v2431_v57  ;;  %v2788_v57 = vld [vmem:[%s3444_s16 + $0x60] sm:$0xff] }
 0x217   : > { %v1316_v62 = vpop.f32.mrf.mxu0 }
 0x218   : > { %v1317_v7 = vadd.f32 %v1316_v62, %v1055_v1  ;;  %v2378_v62 = vld [vmem:[%s3390_s10 + $0x40] sm:$0xf] }
 0x219   : > { %v1342_v0 = vpop.f32.mrf.mxu2 }
 0x21a   : > { %v1343_v2 = vadd.f32 %v1342_v0, %v1057_v61  ;;  %v1355_v4 = vpop.f32.mrf.mxu3  ;;  %v1417_v11 = vpack.c.bf16 %v1317_v7, %v1317_v7  ;;  %v2404_v61 = vld [vmem:[%s3390_s10 + $0x88] sm:$0xf0] }
 0x21b   : > { %v1356_v6 = vadd.f32 %v1355_v4, %v1058_v63  ;;  %v2739_v63 = vld [vmem:[%s3390_s10 + $0x54] sm:$0xf0]  ;;  %v2407_v0 = vor.u32 %v2742_v59, %v2404_v61  ;;  %v2354_v4 = vld [vmem:[%s3390_s10 + $0x10] sm:$0xf] }
 0x21c   : > { %v1418_v5 = vpack.c.bf16 %v1343_v2, %v1343_v2  ;;  %v1329_v10 = vpop.f32.mrf.mxu1  ;;  %v2379_v1 = vor.u32 %v2739_v63, %v2378_v62  ;;  %v2787_v59 = vld [vmem:[%s3444_s16 + $0x58] sm:$0xff]  ;;  %v2786_v61 = vld [vmem:[%s3444_s16 + $0x50] sm:$0xff]  ;;  %v2785_v62 = vld [vmem:[%s3444_s16 + $0x48] sm:$0xff] }
 0x21d   : > { %v1473_v8 = vpack.c.bf16 %v1356_v6, %v1356_v6  ;;  %v1330_v16 = vadd.f32 %v1329_v10, %v1056_v15  ;;  %1377 = vmatpush.bf16.msrb.mxu1 %v2407_v0  ;;  %v2356_v15 = vld [vmem:[%s3390_s10 + $0x28] sm:$0xf0]  ;;  %v2784_v63 = vld [vmem:[%s3444_s16 + $0x40] sm:$0xff] }
 0x21e   : > { %1426 = vmatpush.bf16.xpose.msrb.mxu2 %v1418_v5  ;;  %v2733_v5 = vld [vmem:[%s3390_s10 + $0x24] sm:$0xf0]  ;;  %1365 = vmatpush.bf16.msrb.mxu0 %v2379_v1 }
 0x21f   : > { %v1318_v9 = vpop.f32.mrf.mxu0  ;;  %v1472_v17 = vpack.c.bf16 %v1330_v16, %v1330_v16 }
 0x221   : > { %v1344_v12 = vpop.f32.mrf.mxu2 }
 0x222   : > { %v1357_v13 = vpop.f32.mrf.mxu3  ;;  %v2380_v12 = vld [vmem:[%s3390_s10 + $0x58] sm:$0xf0] }
 0x224   : > { %v1331_v14 = vpop.f32.mrf.mxu1 }
 0x225   : > { %1427 = vmatmul.bf16.vlgmr.msrb.gmra.mxu2 %v1417_v11  ;;  %v2736_v11 = vld [vmem:[%s3390_s10 + $0x44] sm:$0xf]  ;;  %v2730_v14 = vld [vmem:[%s3390_s10 + $0x14] sm:$0xf] }
 0x226   : > { %1481 = vmatpush.bf16.xpose.msra.mxu2 %v1473_v8  ;;  %v2355_v8 = vor.u32 %v2733_v5, %v2354_v4  ;;  %v2383_v13 = vor.u32 %v2736_v11, %v2380_v12  ;;  %v2359_v16 = vor.u32 %v2730_v14, %v2356_v15  ;;  %v2799_v15 = vld [vmem:[%s3462_s0 + $0x38] sm:$0xff] }
 0x228   : > { %1366 = vmatpush.bf16.msrb.mxu0 %v2355_v8  ;;  %1378 = vmatpush.bf16.msrb.mxu1 %v2383_v13 }
 0x22b   : > { %1367 = vmatmul.bf16.vlgmr.msrb.gmra.mxu0 %v3559_v51 }
 0x22c   : > { %1379 = vmatpush.bf16.msrb.mxu1 %v2359_v16 }
 0x22e   : > { %1750 = vmatpush.bf16.msrb.mxu2 %v2799_v15 }
 0x22f   : > { %1380 = vmatmul.bf16.vlgmr.msrb.gmra.mxu1 %v3559_v51 }
 0x230   : > { %1631 = vmatpush.bf16.msra.mxu1 %v2783_v38 }
 0x234   : > { %1632 = vmatpush.bf16.msra.mxu1 %v2782_v40  ;;  %v2937_v40 = vld [vmem:[%s3825_s24] ss:$0 sm:$0xff] }
 0x235   : > { %1482 = vmatmul.bf16.vlgmr.msra.gmra.mxu2 %v1472_v17 }
 0x2a8   : > { %v1428_v36 = vpop.f32.mrf.mxu2  ;;  %v1368_v27 = vpop.f32.mrf.mxu0 }
 0x2a9   : > { %v1432_v39 = vmul.f32 0.25, %v1428_v36  ;;  %v1369_v29 = vadd.f32 %v1368_v27, %v1059_v28 }
 0x2ab   : > { %v1436_v41 = vadd.f32 %v2934_v32, %v1432_v39  ;;  %v1450_v30 = vpack.c.bf16 %v1369_v29, %v1369_v29  ;;  %v2791_v39 = vld [vmem:[%s3444_s16 + $0x78] sm:$0xff] }
 0x2ac   : > { %v1381_v33 = vpop.f32.mrf.mxu1  ;;  %1570 = vmatpush.bf16.msra.mxu0 %v2791_v39 }
 0x2ad   : > { %v1438_v48 = vsel %vm1437_vm4, %v1436_v41, -inf  ;;  %v1456_v31 = vsel %vm1454_vm5, %v1450_v30, 0 }
 0x2ae   : > { %1439 = vmax.xlane.f32.xlu0 %v1438_v48  ;;  %1465 = vmatpush.bf16.msrb.mxu3 %v1456_v31 }
 0x2b0   : > { %v1430_v54 = vpop.f32.mrf.mxu2  ;;  %v1370_v51 = vpop.f32.mrf.mxu0 }
 0x2b4   : > { %v1383_v37 = vpop.f32.mrf.mxu1 }
 0x2b5   : > { %v2936_v37 = vld [vmem:[%s3823_s25] ss:$0 sm:$0xff] }
 0x2b8   : > { %v1483_v2 = vpop.f32.mrf.mxu2 }
 0x2b9   : > { %v1487_v6 = vmul.f32 0.25, %v1483_v2 }
 0x2bb   : > { %v1488_v7 = vadd.f32 %v2934_v32, %v1487_v6  ;;  %v1060_v32 = vperm.slane %v3570_v60, 5  ;;  %v2781_v60 = vld [vmem:[%s3444_s16 + $0x28] sm:$0xff] }
 0x2bc   : > { %1633 = vmatpush.bf16.msra.mxu1 %v2781_v60 }
 0x2bd   : > { %v1489_v9 = vsel %vm1437_vm4, %v1488_v7, -inf  ;;  %v1382_v34 = vadd.f32 %v1381_v33, %v1060_v32 }
 0x2be   : > { %1490 = vmax.xlane.f32.xlu0 %v1489_v9  ;;  %v2935_v9 = vld [vmem:[%s3820_s12] ss:$0 sm:$0xff] }
 0x2bf   : > { %v1501_v35 = vpack.c.bf16 %v1382_v34, %v1382_v34 }
 0x2c0   : > { %v1485_v10 = vpop.f32.mrf.mxu2  ;;  %1634 = vmatpush.bf16.msra.mxu1 %v2780_v45 }
 0x2c1   : > { %v1506_v36 = vsel %vm1454_vm5, %v1501_v35, 0 }
 0x2c2   : > { %1515 = vmatpush.bf16.msra.mxu3 %v1506_v36 }
 0x2c4   : > { %1635 = vmatpush.bf16.msra.mxu1 %v2779_v49 }
 0x2c8   : > { %1636 = vmatpush.bf16.msra.mxu1 %v2778_v50  ;;  %v2938_v50 = vld [vmem:[%s942_s9] ss:$0 sm:$0xff] }
 0x2cc   : > { %1637 = vmatpush.bf16.msra.mxu1 %v2777_v53 }
 0x2d0   : > { %1638 = vmatpush.bf16.msra.mxu1 %v2776_v58 }
 0x321   : > { %v1440_v17 = vpop.xlane.xlu0 %1439 }
 0x322   : > { %v1441_v18 = vsub.f32 %v1436_v41, %v1440_v17  ;;  %v2790_v41 = vld [vmem:[%s3444_s16 + $0x70] sm:$0xff]  ;;  %s3821_s16 = sld [smem:[#allocation21_spill]] }
 0x323   : > { %1571 = vmatpush.bf16.msra.mxu0 %v2790_v41 }
 0x324   : > { %v1442_v19 = vmul.f32 1.442695, %v1441_v18 }
 0x326   : > { %2942 = vpow2.f32 %v1442_v19 }
 0x327   : > { %1572 = vmatpush.bf16.msra.mxu0 %v2789_v44 }
 0x328   : > { %v2807_v27 = vld [vmem:[%s3821_s16 + $0x38] sm:$0xff]  ;;  %v2806_v29 = vld [vmem:[%s3821_s16 + $0x30] sm:$0xff]  ;;  %v2805_v44 = vld [vmem:[%s3821_s16 + $0x28] sm:$0xff] }
 0x329   : > { %v2804_v45 = vld [vmem:[%s3821_s16 + $0x20] sm:$0xff] }
 0x32a   : > { %v2800_v49 = vld [vmem:[%s3821_s16] sm:$0xff] }
 0x32b   : > { %1573 = vmatpush.bf16.msra.mxu0 %v2788_v57 }
 0x32c   : > { %v2943_v20 = vpop.eup %2942 }
 0x32d   : > { %v1444_v21 = vsel %vm1437_vm4, %v2943_v20, 0.0 }
 0x32e   : > { %1445 = vadd.xlane.f32.xlu1 %v1444_v21  ;;  %v2798_v21 = vld [vmem:[%s3462_s0 + $0x30] sm:$0xff] }
 0x32f   : > { %1574 = vmatpush.bf16.msra.mxu0 %v2787_v59  ;;  %1751 = vmatpush.bf16.msrb.mxu2 %v2798_v21 }
 0x331   : > { %v1491_v22 = vpop.xlane.xlu0 %1490 }
 0x332   : > { %v1492_v23 = vsub.f32 %v1488_v7, %v1491_v22  ;;  %v2797_v22 = vld [vmem:[%s3462_s0 + $0x28] sm:$0xff] }
 0x333   : > { %1575 = vmatpush.bf16.msra.mxu0 %v2786_v61  ;;  %1752 = vmatpush.bf16.msrb.mxu2 %v2797_v22 }
 0x334   : > { %v1493_v24 = vmul.f32 1.442695, %v1492_v23  ;;  %v2795_v23 = vld [vmem:[%s3462_s0 + $0x18] sm:$0xff] }
 0x336   : > { %2944 = vpow2.f32 %v1493_v24  ;;  %v2794_v24 = vld [vmem:[%s3462_s0 + $0x10] sm:$0xff] }
 0x337   : > { %1576 = vmatpush.bf16.msra.mxu0 %v2785_v62 }
 0x33b   : > { %1577 = vmatpush.bf16.msra.mxu0 %v2784_v63 }
 0x33c   : > { %v2945_v25 = vpop.eup %2944 }
 0x33d   : > { %v1495_v26 = vsel %vm1437_vm4, %v2945_v25, 0.0 }
 0x33e   : > { %1496 = vadd.xlane.f32.xlu1 %v1495_v26  ;;  %v2792_v26 = vld [vmem:[%s3462_s0] sm:$0xff] }
 0x3a1   : > { %v1446_v42 = vpop.xlane.xlu1 %1445 }
 0x3a2   : > { %2946 = vrcp.f32 %v1446_v42 }
 0x3a8   : > { %v2947_v46 = vpop.eup %2946 }
 0x3a9   : > { %v1448_v47 = vmul.f32 %v2947_v46, %v2943_v20  ;;  %v2803_v46 = vld [vmem:[%s3821_s16 + $0x18] sm:$0xff] }
 0x3ab   : > { %v1449_v48 = vpack.c.bf16 %v1448_v47, %v1448_v47  ;;  %v2802_v47 = vld [vmem:[%s3821_s16 + $0x10] sm:$0xff] }
 0x3ad   : > { %2528 = vmatmul.msk.bf16.vlgmr.msrb.gmra.mxu3 %vm1437_vm4, %v1449_v48  ;;  %v2801_v48 = vld [vmem:[%s3821_s16 + $0x8] sm:$0xff] }
 0x3ae   : > { %1841 = vmatpush.bf16.msrb.mxu3 %v2807_v27 }
 0x3b1   : > { %v1497_v52 = vpop.xlane.xlu1 %1496 }
 0x3b2   : > { %2948 = vrcp.f32 %v1497_v52  ;;  %1842 = vmatpush.bf16.msrb.mxu3 %v2806_v29 }
 0x3b6   : > { %1843 = vmatpush.bf16.msrb.mxu3 %v2805_v44 }
 0x3b8   : > { %v2949_v54 = vpop.eup %2948 }
 0x3b9   : > { %v1499_v55 = vmul.f32 %v2949_v54, %v2945_v25  ;;  %v2793_v25 = vld [vmem:[%s3462_s0 + $0x8] sm:$0xff] }
 0x3ba   : > { %1844 = vmatpush.bf16.msrb.mxu3 %v2804_v45 }
 0x3bb   : > { %v1500_v56 = vpack.c.bf16 %v1499_v55, %v1499_v55 }
 0x3bd   : > { %2529 = vmatmul.msk.bf16.vlgmr.msra.gmra.mxu3 %vm1437_vm4, %v1500_v56 }
 0x3be   : > { %1845 = vmatpush.bf16.msrb.mxu3 %v2803_v46 }
 0x3c2   : > { %1846 = vmatpush.bf16.msrb.mxu3 %v2802_v47 }
 0x3c6   : > { %1847 = vmatpush.bf16.msrb.mxu3 %v2801_v48 }
 0x3ca   : > { %1848 = vmatpush.bf16.msrb.mxu3 %v2800_v49 }
 0x430   : > { %v1467_v0 = vpop.f32.mrf.mxu3 }
 0x431   : > { %v1471_v1 = vpack.c.bf16 %v1467_v0, %v1467_v0 }
 0x433   : > { %1639 = vmatmul.bf16.vlgmr.msra.gmra.mxu1 %v1471_v1 }
 0x438   : > { %v1469_v2 = vpop.f32.mrf.mxu3 }
 0x439   : > { %v2939_v2 = vld [vmem:[%s945_s6] ss:$0 sm:$0xff] }
 0x440   : > { %v1517_v4 = vpop.f32.mrf.mxu3 }
 0x441   : > { %v1521_v5 = vpack.c.bf16 %v1517_v4, %v1517_v4 }
 0x443   : > { %1578 = vmatmul.bf16.vlgmr.msra.gmra.mxu0 %v1521_v5 }
 0x448   : > { %v1519_v6 = vpop.f32.mrf.mxu3 }
 0x4b0   : > { %v1640_v7 = vpop.f32.mrf.mxu1 }
 0x4b8   : > { %v1642_v8 = vpop.f32.mrf.mxu1 }
 0x4c0   : > { %v1579_v10 = vpop.f32.mrf.mxu0 }
 0x4c1   : > { %v1641_v11 = vadd.f32 %v1640_v7, %v1579_v10 }
 0x4c3   : > { %v1648_v12 = vadd.f32 %v2935_v9, %v1641_v11 }
 0x4c5   : > { %v1649_v13 = vadd.f32 %v1648_v12, %v3551_v43  ;;  %v2796_v43 = vld [vmem:[%s3462_s0 + $0x20] sm:$0xff] }
 0x4c6   : > { %1753 = vmatpush.bf16.msrb.mxu2 %v2796_v43  ;;  %v2941_v43 = vld [vmem:[%s951_s28] ss:$0 sm:$0xff]  ;;  %s3830_s28 = sld [smem:[#allocation38_spill]] (!%p2658_p4) }
 0x4c7   : > { %1652 = vadd.xlane.f32.xlu2 %v1649_v13 }
 0x4c8   : > { %v1581_v14 = vpop.f32.mrf.mxu0 }
 0x4ca   : > { %1754 = vmatpush.bf16.msrb.mxu2 %v2795_v23 }
 0x4ce   : > { %1755 = vmatpush.bf16.msrb.mxu2 %v2794_v24 }
 0x4d2   : > { %1756 = vmatpush.bf16.msrb.mxu2 %v2793_v25 }
 0x4d6   : > { %1757 = vmatpush.bf16.msrb.mxu2 %v2792_v26 }
 0x53a   : > { %v1653_v16 = vpop.xlane.xlu2 %1652 }
 0x53b   : > { %v1654_v17 = vmul.f32 0.03125, %v1653_v16 }
 0x53d   : > { %v1655_v18 = vsub.f32 %v1649_v13, %v1654_v17 }
 0x53f   : > { %v1656_v19 = vmul.f32 %v3429_v3, %v1655_v18 }
 0x541   : > { %v1657_v20 = vmul.f32 %v1656_v19, %v1656_v19 }
 0x543   : > { %1658 = vadd.xlane.f32.xlu2 %v1657_v20 }
 0x5b6   : > { %v1659_v51 = vpop.xlane.xlu2 %1658 }
 0x5b7   : > { %v1660_v28 = vmul.f32 0.03125, %v1659_v51 }
 0x5b9   : > { %v1661_v30 = vadd.f32 1e-12, %v1660_v28 }
 0x5bb   : > { %2950 = vrsqrt.f32 %v1661_v30  ;;  %vm1668_vm7 = vweird.f32 %v1661_v30 }
 0x5c1   : > { %v2951_v31 = vpop.eup %2950 }
 0x5c2   : > { %v1663_v32 = vmul.f32 %v2951_v31, %v1661_v30  ;;  %vm1669_vm6 = vweird.f32 %v2951_v31 }
 0x5c3   : > { %vm1670_vm8 = vmor %vm1668_vm7, %vm1669_vm6 }
 0x5c4   : > { %v1664_v33 = vmul.f32 %v2951_v31, %v1663_v32 }
 0x5c6   : > { %v1665_v34 = vmul.f32 0.5, %v1664_v33 }
 0x5c8   : > { %v1666_v35 = vsub.f32 1.5, %v1665_v34 }
 0x5ca   : > { %v1667_v36 = vmul.f32 %v2951_v31, %v1666_v35 }
 0x5cc   : > { %v1671_v38 = vsel %vm1670_vm8, %v2951_v31, %v1667_v36 }
 0x5cd   : > { %v1672_v39 = vmul.f32 %v1671_v38, %v1656_v19 }
 0x5cf   : > { %v1676_v41 = vmul.f32 %v2936_v37, %v1672_v39 }
 0x5d1   : > { %v1680_v42 = vadd.f32 %v2937_v40, %v1676_v41 }
 0x5d3   : > { %v1681_v60 = vpack.c.bf16 %v1680_v42, %v1680_v42 }
 0x5d5   : > { %1758 = vmatmul.bf16.vlgmr.msrb.gmra.mxu2 %v1681_v60 }
 0x658   : > { %v1759_v52 = vpop.f32.mrf.mxu2 }
 0x659   : > { %v1760_v53 = vadd.f32 %v2938_v50, %v1759_v52 }
 0x65b   : > { %v1764_v54 = vmul.f32 0.044715, %v1760_v53  ;;  %v1763_v62 = vmul.f32 0.5, %v1760_v53 }
 0x65d   : > { %v1765_v55 = vmul.f32 %v1764_v54, %v1760_v53 }
 0x65f   : > { %v1766_v56 = vmul.f32 %v1765_v55, %v1760_v53 }
 0x660   : > { %v1761_v57 = vpop.f32.mrf.mxu2 }
 0x661   : > { %v1767_v58 = vadd.f32 %v1766_v56, %v1760_v53 }
 0x663   : > { %v1768_v59 = vmul.f32 0.7978846, %v1767_v58 }
 0x665   : > { %2952 = vtanh.f32 %v1768_v59 }
 0x66b   : > { %v2953_v61 = vpop.eup %2952 }
 0x66c   : > { %v1770_v63 = vadd.f32 1.0, %v2953_v61 }
 0x66e   : > { %v1771_v0 = vmul.f32 %v1770_v63, %v1763_v62 }
 0x670   : > { %v1772_v1 = vpack.c.bf16 %v1771_v0, %v1771_v0 }
 0x672   : > { %1849 = vmatmul.bf16.vlgmr.msrb.gmra.mxu3 %v1772_v1 }
 0x6f5   : > { %v1850_v4 = vpop.f32.mrf.mxu3 }
 0x6f6   : > { %v1851_v5 = vadd.f32 %v2939_v2, %v1850_v4 }
 0x6f8   : > { %v1854_v6 = vadd.f32 %v1851_v5, %v1680_v42 }
 0x6fa   : > { %1857 = vadd.xlane.f32.xlu0 %v1854_v6 }
 0x6fd   : > { %v1852_v7 = vpop.f32.mrf.mxu3 }
 0x76d   : > { %v1858_v8 = vpop.xlane.xlu0 %1857 }
 0x76e   : > { %v1859_v9 = vmul.f32 0.03125, %v1858_v8 }
 0x770   : > { %v1860_v10 = vsub.f32 %v1854_v6, %v1859_v9 }
 0x772   : > { %v1861_v11 = vmul.f32 %v3429_v3, %v1860_v10  ;;  %v2940_v3 = vld [vmem:[%s948_s8] ss:$0 sm:$0xff] }
 0x774   : > { %v1862_v12 = vmul.f32 %v1861_v11, %v1861_v11 }
 0x776   : > { %1863 = vadd.xlane.f32.xlu1 %v1862_v12 }
 0x7e9   : > { %v1864_v13 = vpop.xlane.xlu1 %1863 }
 0x7ea   : > { %v1865_v14 = vmul.f32 0.03125, %v1864_v13 }
 0x7ec   : > { %v1866_v15 = vadd.f32 1e-12, %v1865_v14 }
 0x7ee   : > { %2954 = vrsqrt.f32 %v1866_v15  ;;  %vm1873_vm10 = vweird.f32 %v1866_v15 }
 0x7f4   : > { %v2955_v16 = vpop.eup %2954 }
 0x7f5   : > { %v1868_v17 = vmul.f32 %v2955_v16, %v1866_v15  ;;  %vm1874_vm9 = vweird.f32 %v2955_v16 }
 0x7f6   : > { %vm1875_vm11 = vmor %vm1873_vm10, %vm1874_vm9 }
 0x7f7   : > { %v1869_v18 = vmul.f32 %v2955_v16, %v1868_v17 }
 0x7f9   : > { %v1870_v19 = vmul.f32 0.5, %v1869_v18 }
 0x7fb   : > { %v1871_v20 = vsub.f32 1.5, %v1870_v19 }
 0x7fd   : > { %v1872_v21 = vmul.f32 %v2955_v16, %v1871_v20 }
 0x7ff   : > { %v1876_v22 = vsel %vm1875_vm11, %v2955_v16, %v1872_v21 }
 0x800   : > { %v1877_v23 = vmul.f32 %v1876_v22, %v1861_v11 }
 0x802   : > { %v1881_v24 = vmul.f32 %v2940_v3, %v1877_v23  ;;  %1890 = sbr.rel (%p2658_p4) target bundleno = 2358 (0x936), region = 124 }
 0x804   : > { %v1885_v25 = vadd.f32 %v2941_v43, %v1881_v24 }
 0x806   : > { %1886 = vst [vmem:[%s3479_s14] sm:$0xff] %v1885_v25 }
 0x807   : > { %v2815_v26 = vld [vmem:[#allocation6 + $0x38] sm:$0xff]  ;;  %v2814_v27 = vld [vmem:[#allocation6 + $0x30] sm:$0xff]  ;;  %v2813_v29 = vld [vmem:[#allocation6 + $0x28] sm:$0xff]  ;;  %v1891_v38 = vpack.c.bf16 %v1885_v25, %v1885_v25 }
 0x808   : > { %1957 = vmatpush.bf16.msra.mxu0 %v2815_v26  ;;  %v2823_v51 = vld [vmem:[#allocation7 + $0x38] sm:$0xff]  ;;  %v2822_v28 = vld [vmem:[#allocation7 + $0x30] sm:$0xff]  ;;  %v2821_v30 = vld [vmem:[#allocation7 + $0x28] sm:$0xff] }
 0x809   : > { %2037 = vmatpush.bf16.msra.mxu1 %v2823_v51  ;;  %v2812_v31 = vld [vmem:[#allocation6 + $0x20] sm:$0xff]  ;;  %v2811_v33 = vld [vmem:[#allocation6 + $0x18] sm:$0xff]  ;;  %v2810_v35 = vld [vmem:[#allocation6 + $0x10] sm:$0xff] }
 0x80a   : > { %v2820_v32 = vld [vmem:[#allocation7 + $0x20] sm:$0xff]  ;;  %v2819_v34 = vld [vmem:[#allocation7 + $0x18] sm:$0xff]  ;;  %v2809_v36 = vld [vmem:[#allocation6 + $0x8] sm:$0xff] }
 0x80b   : > { %v2808_v37 = vld [vmem:[#allocation6] sm:$0xff]  ;;  %v2818_v39 = vld [vmem:[#allocation7 + $0x10] sm:$0xff]  ;;  %v2817_v40 = vld [vmem:[#allocation7 + $0x8] sm:$0xff] }
 0x80c   : > { %1958 = vmatpush.bf16.msra.mxu0 %v2814_v27  ;;  %v2816_v41 = vld [vmem:[#allocation7] sm:$0xff] }
 0x80d   : > { %2038 = vmatpush.bf16.msra.mxu1 %v2822_v28  ;;  %v1908_v42 = vld [vmem:[%s3830_s28] sm:$0x1] }
 0x80e   : > { %v1988_v48 = vld [vmem:[%s3831_s18] sm:$0x1] }
 0x810   : > { %1959 = vmatpush.bf16.msra.mxu0 %v2813_v29 }
 0x811   : > { %2039 = vmatpush.bf16.msra.mxu1 %v2821_v30 }
 0x814   : > { %1960 = vmatpush.bf16.msra.mxu0 %v2812_v31 }
 0x815   : > { %2040 = vmatpush.bf16.msra.mxu1 %v2820_v32 }
 0x818   : > { %1961 = vmatpush.bf16.msra.mxu0 %v2811_v33 }
 0x819   : > { %2041 = vmatpush.bf16.msra.mxu1 %v2819_v34 }
 0x81c   : > { %1962 = vmatpush.bf16.msra.mxu0 %v2810_v35 }
 0x81d   : > { %2042 = vmatpush.bf16.msra.mxu1 %v2818_v39 }
 0x820   : > { %1963 = vmatpush.bf16.msra.mxu0 %v2809_v36 }
 0x821   : > { %2043 = vmatpush.bf16.msra.mxu1 %v2817_v40 }
 0x824   : > { %1964 = vmatpush.bf16.msra.mxu0 %v2808_v37 }
 0x825   : > { %2044 = vmatpush.bf16.msra.mxu1 %v2816_v41 }
 0x827   : > { %1965 = vmatmul.bf16.vlgmr.msra.gmra.mxu0 %v1891_v38 }
 0x8a4   : > { %v1966_v60 = vpop.f32.mrf.mxu0 }
 0x8a5   : > { %v1967_v44 = vadd.f32 %v1966_v60, %v1908_v42 }
 0x8a7   : > { %2956 = vtanh.f32 %v1967_v44 }
 0x8ac   : > { %v1968_v45 = vpop.f32.mrf.mxu0 }
 0x8ad   : > { %v2957_v46 = vpop.eup %2956 }
 0x8ae   : > { %v1971_v47 = vpack.c.bf16 %v2957_v46, %v2957_v46 }
 0x8b0   : > { %2045 = vmatmul.bf16.vlgmr.msra.gmra.mxu1 %v1971_v47 }
 0x92d   : > { %v2046_v49 = vpop.f32.mrf.mxu1 }
 0x92e   : > { %v2047_v50 = vadd.f32 %v2046_v49, %v1988_v48 }
 0x930   : > { %2050 = vst [vmem:[%s958_s13] sm:$0x1] %v2047_v50 }
 0x935   : > { %v2048_v52 = vpop.f32.mrf.mxu1 }
 0x936 PF: > { %s3833_s22 = sld [smem:[#allocation17_spill]] }
 0x937   : > { %s3834_s2 = sld [smem:[#allocation13_spill]] }
 0x938   : > { %s3835_s25 = sld [smem:[#allocation14_spill]] }
 0x939   : > { %s3836_s26 = sld [smem:[#allocation20_spill]] }
 0x93a   : > { %s3837_s27 = sld [smem:[#allocation15_spill]] }
 0x93b   : > { %s3838_s3 = sld [smem:[#allocation16_spill]] }
 0x93c   : > { %s39_s0 = sadd.s32 1, %s3833_s22   ;;  %s3839_s28 = sld [smem:[#allocation18_spill]] }
 0x93d   : > { %p36_p6 = scmp.ge.s32.totalorder %s39_s0, 6   ;;  %s3840_s29 = sld [smem:[#allocation19_spill]] }
 0x93f   :  { %38 = sbr.rel (!%p36_p6) target bundleno = 30 (0x1e), region = 217 }
 0x944   :  { %2082 = vsyncpa [#allocation3], 1 }
 0x945   :  { %2084 = vsyncpa [#allocation3 + $0x1], 1 }
 0x946   :  { %2085 = vsyncpa [#allocation5], 1 }
 0x947   :  { %2087 = vsyncpa [#allocation5 + $0x1], 1 }
 0x948   :  { %2088 = vsyncpa [#allocation8], 1 }

</bundles_post_ra>
